<compile_context>
chip_gen: v7x
topology: tpu7x:2x2x1
jax: 0.10.0
libtpu: 0.0.40
codegen_flags: <defaults>
</compile_context>

<pallas_src>
import jax
import jax.numpy as jnp
import numpy as np
from jax import lax
from jax.experimental import pallas as pl
from jax.experimental.pallas import tpu as pltpu

# ---- hyperparameters (the "opt" object) ----
NC = 4        # opt.nc  (input channels)
NDF = 8       # opt.ndf
NZ = 64       # opt.nz  (must be 64: classificationHead is Linear(64, 16))
B = 2         # batch
L = 16        # sequence length (conv stack: 16 -> 8 -> 4 -> 2 -> 1)
BN_EPS = 1e-5
LRELU_SLOPE = 0.2
N_PER_ENC = 3           # inputs that share one encoder: (x, x_noisy, x_fm)

assert NZ == 64, "classificationHead is Linear(64, 16); opt.nz must be 64"
assert L % 8 == 0 and L // 8 >= 2, "need L3 >= 2 so conv4 + avgpool has >= 1 position"
OUT_W = NZ + 64   # packed lane-dense output: z in lanes [:64], score in [64:67]


# ----------------------- the fused Pallas kernel -----------------------
def _fused_kernel(x_ref, w1_ref, w2_ref, g2_ref, b2_ref, w3_ref, g3_ref, b3_ref,
                  w4_ref, hw_ref, hb_ref, out_ref, p1_ref, p2_ref, p3_ref):
    # x_ref block: (1, N, L, C) with N = 3*B rows ordered (input, batch).
    N, Lseq = x_ref.shape[1], x_ref.shape[2]
    NIN = N_PER_ENC
    Bsz = N // NIN
    L1, L2, L3 = Lseq // 2, Lseq // 4, Lseq // 8
    L4 = L3 - 1

    def lrelu(y):
        return jnp.where(y > 0, y, LRELU_SLOPE * y)

    def stage_padded(dst_ref, h):
        # Build [0-pad | data | 0-pad] in registers and write ONE full store:
        # no per-step buffer zeroing, no sublane-offset masked store.
        zpad = jnp.zeros((N, 1, h.shape[-1]), h.dtype)
        dst_ref[...] = jnp.concatenate([zpad, h, zpad], axis=1)

    def conv_s2(src_ref, w_ref, Lout):
        # Conv1d(k=4, stride=2, pad=1, bias=False) as 4 accumulated per-tap MXU
        # matmuls (bf16 in, f32 acc) from strided reads of the padded scratch.
        w = w_ref[0]                                               # (4, Cin, Cout)
        acc = None
        for k in range(4):
            tap = src_ref[:, pl.ds(k, Lout, stride=2), :]          # (N, Lout, Cin)
            tap = tap.reshape(N * Lout, tap.shape[-1]).astype(jnp.bfloat16)
            y = jnp.dot(tap, w[k], preferred_element_type=jnp.float32)
            acc = y if acc is None else acc + y
        return acc                                                 # (N*Lout, Cout) f32

    def bn_lrelu(y, g, b, Lout):
        # BatchNorm1d training mode PER INPUT: biased stats over (batch, length)
        # only -> reduce axis=1 of (3, B*Lout, C); f32 math.
        C = y.shape[-1]
        y3 = y.reshape(NIN, Bsz * Lout, C)
        mean = jnp.mean(y3, axis=1, keepdims=True)
        var = jnp.mean(jnp.square(y3 - mean), axis=1, keepdims=True)
        y3 = (y3 - mean) * lax.rsqrt(var + BN_EPS) * g + b
        return lrelu(y3).reshape(N * Lout, C)

    # ---- layer 1: Conv1d(nc, ndf, 4, 2, 1) + LeakyReLU(0.2) ----
    stage_padded(p1_ref, x_ref[0])
    h1 = lrelu(conv_s2(p1_ref, w1_ref, L1))                        # (N*L1, ndf)

    # ---- layer 2: Conv1d(ndf, 2ndf, 4, 2, 1) + BN + LReLU ----
    stage_padded(p2_ref, h1.reshape(N, L1, NDF))
    h2 = bn_lrelu(conv_s2(p2_ref, w2_ref, L2), g2_ref[0], b2_ref[0], L2)

    # ---- layer 3: Conv1d(2ndf, 4ndf, 4, 2, 1) + BN + LReLU ----
    stage_padded(p3_ref, h2.reshape(N, L2, 2 * NDF))
    h3 = bn_lrelu(conv_s2(p3_ref, w3_ref, L3), g3_ref[0], b3_ref[0], L3)
    h3 = h3.reshape(N, L3, 4 * NDF)

    # ---- layer 4: Conv1d(4ndf, nz, 2, 1, 0) + AdaptiveAvgPool1d(1) ----
    w4 = w4_ref[0]                                                 # (2, 4ndf, nz)
    acc = None
    for k in range(2):
        tap = h3[:, k:k + L4, :].reshape(N * L4, 4 * NDF).astype(jnp.bfloat16)
        y = jnp.dot(tap, w4[k], preferred_element_type=jnp.float32)
        acc = y if acc is None else acc + y
    z = jnp.mean(acc.reshape(N, L4, NZ), axis=1)                   # (N, nz) f32

    # fused classification head: Linear(64,16) o Linear(16,3) == Linear(64,3)
    # (exact: no nonlinearity between the two Linears), padded to 64 lanes; f32.
    s = jnp.dot(z, hw_ref[0], preferred_element_type=jnp.float32) + hb_ref[0]

    # single lane-dense (3*B, 128) store: z in lanes [:64], score in [64:67]
    out_ref[0] = jnp.concatenate([z, s], axis=-1)


def _fused_call(kp, xs):
    n_enc, N, Lseq, Cin = xs.shape          # (2, 3*B, L, C): step 0 -> T, step 1 -> F
    wmap = lambda i: (i, 0, 0, 0)           # per-tap packed conv weights
    vmap3 = lambda i: (i, 0, 0)             # BN params / head / output
    cost = pl.CostEstimate(flops=400_000, transcendentals=256, bytes_accessed=1 << 17)
    return pl.pallas_call(
        _fused_kernel,
        out_shape=jax.ShapeDtypeStruct((n_enc, N, OUT_W), jnp.float32),
        grid_spec=pltpu.PrefetchScalarGridSpec(
            num_scalar_prefetch=0,
            grid=(n_enc,),
            in_specs=[
                pl.BlockSpec((1, N, Lseq, Cin), lambda i: (i, 0, 0, 0)),
                pl.BlockSpec((1, 4, NC, NDF), wmap),            # w1 per-tap packed
                pl.BlockSpec((1, 4, NDF, 2 * NDF), wmap),       # w2
                pl.BlockSpec((1, 1, 2 * NDF), vmap3),           # bn2 gamma
                pl.BlockSpec((1, 1, 2 * NDF), vmap3),           # bn2 beta
                pl.BlockSpec((1, 4, 2 * NDF, 4 * NDF), wmap),   # w3
                pl.BlockSpec((1, 1, 4 * NDF), vmap3),           # bn3 gamma
                pl.BlockSpec((1, 1, 4 * NDF), vmap3),           # bn3 beta
                pl.BlockSpec((1, 2, 4 * NDF, NZ), wmap),        # w4
                pl.BlockSpec((1, NZ, 64), vmap3),               # fused head W (padded)
                pl.BlockSpec((1, 1, 64), vmap3),                # fused head b (padded)
            ],
            out_specs=pl.BlockSpec((1, N, OUT_W), vmap3),
            scratch_shapes=[
                pltpu.VMEM((N, Lseq + 2, NC), jnp.float32),            # padded input
                pltpu.VMEM((N, Lseq // 2 + 2, NDF), jnp.float32),      # padded layer-1 out
                pltpu.VMEM((N, Lseq // 4 + 2, 2 * NDF), jnp.float32),  # padded layer-2 out
            ]),
        compiler_params=pltpu.CompilerParams(
            dimension_semantics=("parallel",)),   # v7x: Encoder_T / Encoder_F on separate TCs
        cost_estimate=cost,
    )(xs, kp['w1p'], kp['w2p'], kp['g2'], kp['b2'],
      kp['w3p'], kp['g3'], kp['b3'], kp['w4p'], kp['hw'], kp['hb'])


# ----------------------- parameters -----------------------
def _pack_conv_w(w):
    # torch Conv1d weight (O, I, K) -> (K, I, O): one (Cin, Cout) matrix per tap.
    return jnp.transpose(w, (2, 1, 0))


def _init_encoder(k):
    k1, k2, k3, k4 = jax.random.split(k, 4)
    return dict(
        w1=0.1 * jax.random.normal(k1, (NDF, NC, 4), jnp.float32),
        w2=0.1 * jax.random.normal(k2, (NDF * 2, NDF, 4), jnp.float32),
        w3=0.1 * jax.random.normal(k3, (NDF * 4, NDF * 2, 4), jnp.float32),
        w4=0.1 * jax.random.normal(k4, (NZ, NDF * 4, 2), jnp.float32),
        g2=jnp.ones((NDF * 2,), jnp.float32), b2=jnp.zeros((NDF * 2,), jnp.float32),
        g3=jnp.ones((NDF * 4,), jnp.float32), b3=jnp.zeros((NDF * 4,), jnp.float32))


def _init_head(k):
    k1, k2, k3, k4 = jax.random.split(k, 4)
    return dict(w1=0.1 * jax.random.normal(k1, (16, 64), jnp.float32),
                b1=0.1 * jax.random.normal(k2, (16,), jnp.float32),
                w2=0.1 * jax.random.normal(k3, (3, 16), jnp.float32),
                b2=0.1 * jax.random.normal(k4, (3,), jnp.float32))


def _fuse_head(h):
    # Linear(64,16) -> Linear(16,3) with no activation in between == Linear(64,3).
    Wf = h['w1'].T @ h['w2'].T                       # (64, 3)
    bf = h['b1'] @ h['w2'].T + h['b2']               # (3,)
    Wp = jnp.zeros((NZ, 64), jnp.float32).at[:, :3].set(Wf)
    bp = jnp.zeros((1, 64), jnp.float32).at[0, :3].set(bf)
    return Wp, bp


def init_params(key):
    kT, kF, kHT, kHF = jax.random.split(key, 4)
    enc_T, enc_F = _init_encoder(kT), _init_encoder(kF)
    head_T, head_F = _init_head(kHT), _init_head(kHF)

    def stack_pack(name):   # conv weights per-tap packed, cast to bf16 (MXU input)
        return jnp.stack([_pack_conv_w(enc_T[name]),
                          _pack_conv_w(enc_F[name])], axis=0).astype(jnp.bfloat16)

    def stack_vec(name):    # BN affine params stay f32
        return jnp.stack([enc_T[name].reshape(1, -1),
                          enc_F[name].reshape(1, -1)], axis=0)

    hwT, hbT = _fuse_head(head_T)
    hwF, hbF = _fuse_head(head_F)
    kernel_params = dict(
        w1p=stack_pack('w1'), w2p=stack_pack('w2'),
        w3p=stack_pack('w3'), w4p=stack_pack('w4'),
        g2=stack_vec('g2'), b2=stack_vec('b2'),
        g3=stack_vec('g3'), b3=stack_vec('b3'),
        hw=jnp.stack([hwT, hwF], axis=0),
        hb=jnp.stack([hbT, hbF], axis=0))
    return dict(enc_T=enc_T, enc_F=enc_F, head_T=head_T, head_F=head_F,
                kernel=kernel_params)


# ----------------------- base_Model.forward -----------------------
@jax.jit
def base_model_forward(params, x, x_noisy, x_fm, x_f, x_noisy_f, x_fm_f):
    # TODO(synk): torch.isnan host-side debug print and the ngpu/data_parallel
    # branch are host / multi-GPU plumbing with no kernel-level equivalent; skipped.
    xs = jnp.stack([x, x_noisy, x_fm, x_f, x_noisy_f, x_fm_f], axis=0)   # (6, B, C, L)
    xs = jnp.transpose(xs, (0, 1, 3, 2)).astype(jnp.float32)             # one NCL->NLC transpose
    xs = xs.reshape(2, N_PER_ENC * B, L, NC)                             # (2 encoders, 3*B, L, C)
    packed = _fused_call(params['kernel'], xs)                            # (2, 3*B, 128)
    packed = packed.reshape(2, N_PER_ENC, B, OUT_W)
    zs = tuple(packed[i // 3, i % 3, :, :NZ] for i in range(6))
    ss = tuple(packed[i // 3, i % 3, :, NZ:NZ + 3] for i in range(6))
    return zs + ss


# ----------------------- pure-JAX reference (for verification) -----------------------
def _ref_single(x_ncl, enc, head):
    def conv1d(x, w, stride, pad):
        return lax.conv_general_dilated(x, w, (stride,), [(pad, pad)],
                                        dimension_numbers=('NCH', 'OIH', 'NCH'))

    def bn(y, g, b):
        mean = jnp.mean(y, axis=(0, 2), keepdims=True)
        var = jnp.mean((y - mean) ** 2, axis=(0, 2), keepdims=True)
        return ((y - mean) * lax.rsqrt(var + BN_EPS)
                * g.reshape(1, -1, 1) + b.reshape(1, -1, 1))

    lr = lambda y: jnp.where(y > 0, y, LRELU_SLOPE * y)
    y = lr(conv1d(x_ncl, enc['w1'], 2, 1))
    y = lr(bn(conv1d(y, enc['w2'], 2, 1), enc['g2'], enc['b2']))
    y = lr(bn(conv1d(y, enc['w3'], 2, 1), enc['g3'], enc['b3']))
    y = conv1d(y, enc['w4'], 1, 0)
    z = jnp.mean(y, axis=2)                    # AdaptiveAvgPool1d(1) + squeeze
    s = z @ head['w1'].T + head['b1']
    s = s @ head['w2'].T + head['b2']
    return z, s


if __name__ == "__main__":
    key = jax.random.PRNGKey(0)
    pkey, dkey = jax.random.split(key)
    params = init_params(pkey)

    dks = jax.random.split(dkey, 6)
    inputs = [jax.random.normal(dks[i], (B, NC, L), jnp.float32) for i in range(6)]

    outs = jax.block_until_ready(base_model_forward(params, *inputs))

    # verify every output against the f32 pure-JAX reference. The kernel feeds
    # the MXU bf16 inputs (f32 accumulation), so the tolerance is widened
    # accordingly vs the all-f32 reference.
    encs = [params['enc_T']] * 3 + [params['enc_F']] * 3
    heads = [params['head_T']] * 3 + [params['head_F']] * 3
    for i in range(6):
        z_ref, s_ref = _ref_single(inputs[i], encs[i], heads[i])
        np.testing.assert_allclose(np.asarray(outs[i]), np.asarray(z_ref),
                                   rtol=5e-2, atol=5e-2)
        np.testing.assert_allclose(np.asarray(outs[6 + i]), np.asarray(s_ref),
                                   rtol=5e-2, atol=5e-2)
    assert outs[0].shape == (B, NZ) and outs[6].shape == (B, 3)

    print("KERNEL_OK")
</pallas_src>

<mosaic_0001>
module attributes {stable_mosaic.version = 11 : i64} {
  func.func @_fused_kernel(%arg0: i32, %arg1: memref<1x6x16x4xf32, #tpu.memory_space<vmem>>, %arg2: memref<1x4x4x8xbf16, #tpu.memory_space<vmem>>, %arg3: memref<1x4x8x16xbf16, #tpu.memory_space<vmem>>, %arg4: memref<1x1x16xf32, #tpu.memory_space<vmem>>, %arg5: memref<1x1x16xf32, #tpu.memory_space<vmem>>, %arg6: memref<1x4x16x32xbf16, #tpu.memory_space<vmem>>, %arg7: memref<1x1x32xf32, #tpu.memory_space<vmem>>, %arg8: memref<1x1x32xf32, #tpu.memory_space<vmem>>, %arg9: memref<1x2x32x64xbf16, #tpu.memory_space<vmem>>, %arg10: memref<1x64x64xf32, #tpu.memory_space<vmem>>, %arg11: memref<1x1x64xf32, #tpu.memory_space<vmem>>, %arg12: memref<1x6x128xf32, #tpu.memory_space<vmem>>, %arg13: memref<6x18x4xf32, #tpu.memory_space<vmem>>, %arg14: memref<6x10x8xf32, #tpu.memory_space<vmem>>, %arg15: memref<6x6x16xf32, #tpu.memory_space<vmem>>) attributes {dimension_semantics = [#tpu.dimension_semantics<parallel>], iteration_bounds = array<i64: 2>, scalar_prefetch = 0 : i64, scratch_operands = 3 : i64, tpu.core_type = #tpu.core_type<tc>, window_params = [{transform_indices = @transform_0, window_bounds = array<i64: 1, 6, 16, 4>}, {transform_indices = @transform_1, window_bounds = array<i64: 1, 4, 4, 8>}, {transform_indices = @transform_2, window_bounds = array<i64: 1, 4, 8, 16>}, {transform_indices = @transform_3, window_bounds = array<i64: 1, 1, 16>}, {transform_indices = @transform_4, window_bounds = array<i64: 1, 1, 16>}, {transform_indices = @transform_5, window_bounds = array<i64: 1, 4, 16, 32>}, {transform_indices = @transform_6, window_bounds = array<i64: 1, 1, 32>}, {transform_indices = @transform_7, window_bounds = array<i64: 1, 1, 32>}, {transform_indices = @transform_8, window_bounds = array<i64: 1, 2, 32, 64>}, {transform_indices = @transform_9, window_bounds = array<i64: 1, 64, 64>}, {transform_indices = @transform_10, window_bounds = array<i64: 1, 1, 64>}, {transform_indices = @transform_11, window_bounds = array<i64: 1, 6, 128>}]} {
    %c0 = arith.constant 0 : index
    %c0_0 = arith.constant 0 : index
    %c0_1 = arith.constant 0 : index
    %c0_2 = arith.constant 0 : index
    %0 = vector.load %arg1[%c0, %c0_0, %c0_1, %c0_2] : memref<1x6x16x4xf32, #tpu.memory_space<vmem>>, vector<1x6x16x4xf32>
    %1 = vector.shape_cast %0 : vector<1x6x16x4xf32> to vector<6x16x4xf32>
    %cst = arith.constant 0.000000e+00 : f32
    %2 = vector.broadcast %cst : f32 to vector<6x1x4xf32>
    %3 = tpu.concatenate %2, %1, %2 in 1 : vector<6x1x4xf32>, vector<6x16x4xf32>, vector<6x1x4xf32> -> vector<6x18x4xf32>
    %c0_3 = arith.constant 0 : index
    %c0_4 = arith.constant 0 : index
    %c0_5 = arith.constant 0 : index
    %4 = vector.load %arg13[%c0_3, %c0_4, %c0_5] : memref<6x18x4xf32, #tpu.memory_space<vmem>>, vector<6x18x4xf32>
    tpu.vector_store %arg13[%c0_3, %c0_4, %c0_5], %3 {strides = array<i32>} : memref<6x18x4xf32, #tpu.memory_space<vmem>>, vector<6x18x4xf32>,
    %c0_6 = arith.constant 0 : index
    %c0_7 = arith.constant 0 : index
    %c0_8 = arith.constant 0 : index
    %c0_9 = arith.constant 0 : index
    %5 = vector.load %arg2[%c0_6, %c0_7, %c0_8, %c0_9] : memref<1x4x4x8xbf16, #tpu.memory_space<vmem>>, vector<1x4x4x8xbf16>
    %6 = vector.shape_cast %5 : vector<1x4x4x8xbf16> to vector<4x4x8xbf16>
    %c0_10 = arith.constant 0 : index
    %c0_11 = arith.constant 0 : index
    %c0_12 = arith.constant 0 : index
    %7 = tpu.strided_load %arg13[%c0_10, %c0_11, %c0_12] {strides = array<i32: 1, 2, 1>} : memref<6x18x4xf32, #tpu.memory_space<vmem>>, vector<6x8x4xf32>
    %8 = vector.shape_cast %7 : vector<6x8x4xf32> to vector<48x4xf32>
    %9 = arith.truncf %8 : vector<48x4xf32> to vector<48x4xbf16>
    %10 = vector.extract_strided_slice %6 {offsets = [0, 0, 0], sizes = [1, 4, 8], strides = [1, 1, 1]} : vector<4x4x8xbf16> to vector<1x4x8xbf16>
    %11 = vector.shape_cast %10 : vector<1x4x8xbf16> to vector<4x8xbf16>
    %cst_13 = arith.constant dense<0.000000e+00> : vector<48x8xf32>
    %12 = tpu.matmul %9, %11, %cst_13 {dimension_numbers = #tpu.dot_dimension_numbers<[1], [0], [0], [1], [0, 0, 1, 1], [], []>} : vector<48x4xbf16>, vector<4x8xbf16>, vector<48x8xf32> -> vector<48x8xf32>
    %c0_14 = arith.constant 0 : index
    %c1 = arith.constant 1 : index
    %c0_15 = arith.constant 0 : index
    %13 = tpu.strided_load %arg13[%c0_14, %c1, %c0_15] {strides = array<i32: 1, 2, 1>} : memref<6x18x4xf32, #tpu.memory_space<vmem>>, vector<6x8x4xf32>
    %14 = vector.shape_cast %13 : vector<6x8x4xf32> to vector<48x4xf32>
    %15 = arith.truncf %14 : vector<48x4xf32> to vector<48x4xbf16>
    %16 = vector.extract_strided_slice %6 {offsets = [1, 0, 0], sizes = [1, 4, 8], strides = [1, 1, 1]} : vector<4x4x8xbf16> to vector<1x4x8xbf16>
    %17 = vector.shape_cast %16 : vector<1x4x8xbf16> to vector<4x8xbf16>
    %cst_16 = arith.constant dense<0.000000e+00> : vector<48x8xf32>
    %18 = tpu.matmul %15, %17, %cst_16 {dimension_numbers = #tpu.dot_dimension_numbers<[1], [0], [0], [1], [0, 0, 1, 1], [], []>} : vector<48x4xbf16>, vector<4x8xbf16>, vector<48x8xf32> -> vector<48x8xf32>
    %19 = arith.addf %12, %18 : vector<48x8xf32>
    %c0_17 = arith.constant 0 : index
    %c2 = arith.constant 2 : index
    %c0_18 = arith.constant 0 : index
    %20 = tpu.strided_load %arg13[%c0_17, %c2, %c0_18] {strides = array<i32: 1, 2, 1>} : memref<6x18x4xf32, #tpu.memory_space<vmem>>, vector<6x8x4xf32>
    %21 = vector.shape_cast %20 : vector<6x8x4xf32> to vector<48x4xf32>
    %22 = arith.truncf %21 : vector<48x4xf32> to vector<48x4xbf16>
    %23 = vector.extract_strided_slice %6 {offsets = [2, 0, 0], sizes = [1, 4, 8], strides = [1, 1, 1]} : vector<4x4x8xbf16> to vector<1x4x8xbf16>
    %24 = vector.shape_cast %23 : vector<1x4x8xbf16> to vector<4x8xbf16>
    %cst_19 = arith.constant dense<0.000000e+00> : vector<48x8xf32>
    %25 = tpu.matmul %22, %24, %cst_19 {dimension_numbers = #tpu.dot_dimension_numbers<[1], [0], [0], [1], [0, 0, 1, 1], [], []>} : vector<48x4xbf16>, vector<4x8xbf16>, vector<48x8xf32> -> vector<48x8xf32>
    %26 = arith.addf %19, %25 : vector<48x8xf32>
    %c0_20 = arith.constant 0 : index
    %c3 = arith.constant 3 : index
    %c0_21 = arith.constant 0 : index
    %27 = tpu.strided_load %arg13[%c0_20, %c3, %c0_21] {strides = array<i32: 1, 2, 1>} : memref<6x18x4xf32, #tpu.memory_space<vmem>>, vector<6x8x4xf32>
    %28 = vector.shape_cast %27 : vector<6x8x4xf32> to vector<48x4xf32>
    %29 = arith.truncf %28 : vector<48x4xf32> to vector<48x4xbf16>
    %30 = vector.extract_strided_slice %6 {offsets = [3, 0, 0], sizes = [1, 4, 8], strides = [1, 1, 1]} : vector<4x4x8xbf16> to vector<1x4x8xbf16>
    %31 = vector.shape_cast %30 : vector<1x4x8xbf16> to vector<4x8xbf16>
    %cst_22 = arith.constant dense<0.000000e+00> : vector<48x8xf32>
    %32 = tpu.matmul %29, %31, %cst_22 {dimension_numbers = #tpu.dot_dimension_numbers<[1], [0], [0], [1], [0, 0, 1, 1], [], []>} : vector<48x4xbf16>, vector<4x8xbf16>, vector<48x8xf32> -> vector<48x8xf32>
    %33 = arith.addf %26, %32 : vector<48x8xf32>
    %cst_23 = arith.constant 0.000000e+00 : f32
    %34 = vector.broadcast %cst_23 : f32 to vector<48x8xf32>
    %35 = arith.cmpf ogt, %33, %34 : vector<48x8xf32>
    %cst_24 = arith.constant 2.000000e-01 : f32
    %36 = vector.broadcast %cst_24 : f32 to vector<48x8xf32>
    %37 = arith.mulf %36, %33 : vector<48x8xf32>
    %38 = arith.select %35, %33, %37 : vector<48x8xi1>, vector<48x8xf32>
    %39 = vector.shape_cast %38 : vector<48x8xf32> to vector<6x8x8xf32>
    %cst_25 = arith.constant 0.000000e+00 : f32
    %40 = vector.broadcast %cst_25 : f32 to vector<6x1x8xf32>
    %41 = tpu.concatenate %40, %39, %40 in 1 : vector<6x1x8xf32>, vector<6x8x8xf32>, vector<6x1x8xf32> -> vector<6x10x8xf32>
    %c0_26 = arith.constant 0 : index
    %c0_27 = arith.constant 0 : index
    %c0_28 = arith.constant 0 : index
    %42 = vector.load %arg14[%c0_26, %c0_27, %c0_28] : memref<6x10x8xf32, #tpu.memory_space<vmem>>, vector<6x10x8xf32>
    tpu.vector_store %arg14[%c0_26, %c0_27, %c0_28], %41 {strides = array<i32>} : memref<6x10x8xf32, #tpu.memory_space<vmem>>, vector<6x10x8xf32>,
    %c0_29 = arith.constant 0 : index
    %c0_30 = arith.constant 0 : index
    %c0_31 = arith.constant 0 : index
    %c0_32 = arith.constant 0 : index
    %43 = vector.load %arg3[%c0_29, %c0_30, %c0_31, %c0_32] : memref<1x4x8x16xbf16, #tpu.memory_space<vmem>>, vector<1x4x8x16xbf16>
    %44 = vector.shape_cast %43 : vector<1x4x8x16xbf16> to vector<4x8x16xbf16>
    %c0_33 = arith.constant 0 : index
    %c0_34 = arith.constant 0 : index
    %c0_35 = arith.constant 0 : index
    %45 = tpu.strided_load %arg14[%c0_33, %c0_34, %c0_35] {strides = array<i32: 1, 2, 1>} : memref<6x10x8xf32, #tpu.memory_space<vmem>>, vector<6x4x8xf32>
    %46 = vector.shape_cast %45 : vector<6x4x8xf32> to vector<24x8xf32>
    %47 = arith.truncf %46 : vector<24x8xf32> to vector<24x8xbf16>
    %48 = vector.extract_strided_slice %44 {offsets = [0, 0, 0], sizes = [1, 8, 16], strides = [1, 1, 1]} : vector<4x8x16xbf16> to vector<1x8x16xbf16>
    %49 = vector.shape_cast %48 : vector<1x8x16xbf16> to vector<8x16xbf16>
    %cst_36 = arith.constant dense<0.000000e+00> : vector<24x16xf32>
    %50 = tpu.matmul %47, %49, %cst_36 {dimension_numbers = #tpu.dot_dimension_numbers<[1], [0], [0], [1], [0, 0, 1, 1], [], []>} : vector<24x8xbf16>, vector<8x16xbf16>, vector<24x16xf32> -> vector<24x16xf32>
    %c0_37 = arith.constant 0 : index
    %c1_38 = arith.constant 1 : index
    %c0_39 = arith.constant 0 : index
    %51 = tpu.strided_load %arg14[%c0_37, %c1_38, %c0_39] {strides = array<i32: 1, 2, 1>} : memref<6x10x8xf32, #tpu.memory_space<vmem>>, vector<6x4x8xf32>
    %52 = vector.shape_cast %51 : vector<6x4x8xf32> to vector<24x8xf32>
    %53 = arith.truncf %52 : vector<24x8xf32> to vector<24x8xbf16>
    %54 = vector.extract_strided_slice %44 {offsets = [1, 0, 0], sizes = [1, 8, 16], strides = [1, 1, 1]} : vector<4x8x16xbf16> to vector<1x8x16xbf16>
    %55 = vector.shape_cast %54 : vector<1x8x16xbf16> to vector<8x16xbf16>
    %cst_40 = arith.constant dense<0.000000e+00> : vector<24x16xf32>
    %56 = tpu.matmul %53, %55, %cst_40 {dimension_numbers = #tpu.dot_dimension_numbers<[1], [0], [0], [1], [0, 0, 1, 1], [], []>} : vector<24x8xbf16>, vector<8x16xbf16>, vector<24x16xf32> -> vector<24x16xf32>
    %57 = arith.addf %50, %56 : vector<24x16xf32>
    %c0_41 = arith.constant 0 : index
    %c2_42 = arith.constant 2 : index
    %c0_43 = arith.constant 0 : index
    %58 = tpu.strided_load %arg14[%c0_41, %c2_42, %c0_43] {strides = array<i32: 1, 2, 1>} : memref<6x10x8xf32, #tpu.memory_space<vmem>>, vector<6x4x8xf32>
    %59 = vector.shape_cast %58 : vector<6x4x8xf32> to vector<24x8xf32>
    %60 = arith.truncf %59 : vector<24x8xf32> to vector<24x8xbf16>
    %61 = vector.extract_strided_slice %44 {offsets = [2, 0, 0], sizes = [1, 8, 16], strides = [1, 1, 1]} : vector<4x8x16xbf16> to vector<1x8x16xbf16>
    %62 = vector.shape_cast %61 : vector<1x8x16xbf16> to vector<8x16xbf16>
    %cst_44 = arith.constant dense<0.000000e+00> : vector<24x16xf32>
    %63 = tpu.matmul %60, %62, %cst_44 {dimension_numbers = #tpu.dot_dimension_numbers<[1], [0], [0], [1], [0, 0, 1, 1], [], []>} : vector<24x8xbf16>, vector<8x16xbf16>, vector<24x16xf32> -> vector<24x16xf32>
    %64 = arith.addf %57, %63 : vector<24x16xf32>
    %c0_45 = arith.constant 0 : index
    %c3_46 = arith.constant 3 : index
    %c0_47 = arith.constant 0 : index
    %65 = tpu.strided_load %arg14[%c0_45, %c3_46, %c0_47] {strides = array<i32: 1, 2, 1>} : memref<6x10x8xf32, #tpu.memory_space<vmem>>, vector<6x4x8xf32>
    %66 = vector.shape_cast %65 : vector<6x4x8xf32> to vector<24x8xf32>
    %67 = arith.truncf %66 : vector<24x8xf32> to vector<24x8xbf16>
    %68 = vector.extract_strided_slice %44 {offsets = [3, 0, 0], sizes = [1, 8, 16], strides = [1, 1, 1]} : vector<4x8x16xbf16> to vector<1x8x16xbf16>
    %69 = vector.shape_cast %68 : vector<1x8x16xbf16> to vector<8x16xbf16>
    %cst_48 = arith.constant dense<0.000000e+00> : vector<24x16xf32>
    %70 = tpu.matmul %67, %69, %cst_48 {dimension_numbers = #tpu.dot_dimension_numbers<[1], [0], [0], [1], [0, 0, 1, 1], [], []>} : vector<24x8xbf16>, vector<8x16xbf16>, vector<24x16xf32> -> vector<24x16xf32>
    %71 = arith.addf %64, %70 : vector<24x16xf32>
    %c0_49 = arith.constant 0 : index
    %c0_50 = arith.constant 0 : index
    %c0_51 = arith.constant 0 : index
    %72 = vector.load %arg4[%c0_49, %c0_50, %c0_51] : memref<1x1x16xf32, #tpu.memory_space<vmem>>, vector<1x1x16xf32>
    %73 = vector.shape_cast %72 : vector<1x1x16xf32> to vector<1x16xf32>
    %c0_52 = arith.constant 0 : index
    %c0_53 = arith.constant 0 : index
    %c0_54 = arith.constant 0 : index
    %74 = vector.load %arg5[%c0_52, %c0_53, %c0_54] : memref<1x1x16xf32, #tpu.memory_space<vmem>>, vector<1x1x16xf32>
    %75 = vector.shape_cast %74 : vector<1x1x16xf32> to vector<1x16xf32>
    %76 = vector.shape_cast %71 : vector<24x16xf32> to vector<3x8x16xf32>
    %cst_55 = arith.constant dense<0.000000e+00> : vector<3x16xf32>
    %77 = vector.multi_reduction <add>, %76, %cst_55 [1] : vector<3x8x16xf32> to vector<3x16xf32>
    %78 = vector.shape_cast %77 : vector<3x16xf32> to vector<3x1x16xf32>
    %cst_56 = arith.constant 8.000000e+00 : f32
    %79 = vector.broadcast %cst_56 : f32 to vector<3x1x16xf32>
    %80 = arith.divf %78, %79 : vector<3x1x16xf32>
    %81 = vector.broadcast %80 : vector<3x1x16xf32> to vector<3x8x16xf32>
    %82 = arith.subf %76, %81 : vector<3x8x16xf32>
    %83 = arith.mulf %82, %82 : vector<3x8x16xf32>
    %cst_57 = arith.constant dense<0.000000e+00> : vector<3x16xf32>
    %84 = vector.multi_reduction <add>, %83, %cst_57 [1] : vector<3x8x16xf32> to vector<3x16xf32>
    %85 = vector.shape_cast %84 : vector<3x16xf32> to vector<3x1x16xf32>
    %cst_58 = arith.constant 8.000000e+00 : f32
    %86 = vector.broadcast %cst_58 : f32 to vector<3x1x16xf32>
    %87 = arith.divf %85, %86 : vector<3x1x16xf32>
    %88 = vector.broadcast %80 : vector<3x1x16xf32> to vector<3x8x16xf32>
    %89 = arith.subf %76, %88 : vector<3x8x16xf32>
    %cst_59 = arith.constant 9.99999974E-6 : f32
    %90 = vector.broadcast %cst_59 : f32 to vector<3x1x16xf32>
    %91 = arith.addf %87, %90 : vector<3x1x16xf32>
    %92 = math.rsqrt %91 : vector<3x1x16xf32>
    %93 = vector.broadcast %92 : vector<3x1x16xf32> to vector<3x8x16xf32>
    %94 = arith.mulf %89, %93 : vector<3x8x16xf32>
    %95 = vector.shape_cast %73 : vector<1x16xf32> to vector<1x1x16xf32>
    %96 = vector.broadcast %95 : vector<1x1x16xf32> to vector<3x8x16xf32>
    %97 = arith.mulf %94, %96 : vector<3x8x16xf32>
    %98 = vector.shape_cast %75 : vector<1x16xf32> to vector<1x1x16xf32>
    %99 = vector.broadcast %98 : vector<1x1x16xf32> to vector<3x8x16xf32>
    %100 = arith.addf %97, %99 : vector<3x8x16xf32>
    %cst_60 = arith.constant 0.000000e+00 : f32
    %101 = vector.broadcast %cst_60 : f32 to vector<3x8x16xf32>
    %102 = arith.cmpf ogt, %100, %101 : vector<3x8x16xf32>
    %cst_61 = arith.constant 2.000000e-01 : f32
    %103 = vector.broadcast %cst_61 : f32 to vector<3x8x16xf32>
    %104 = arith.mulf %103, %100 : vector<3x8x16xf32>
    %105 = arith.select %102, %100, %104 : vector<3x8x16xi1>, vector<3x8x16xf32>
    %106 = vector.shape_cast %105 : vector<3x8x16xf32> to vector<24x16xf32>
    %107 = vector.shape_cast %106 : vector<24x16xf32> to vector<6x4x16xf32>
    %cst_62 = arith.constant 0.000000e+00 : f32
    %108 = vector.broadcast %cst_62 : f32 to vector<6x1x16xf32>
    %109 = tpu.concatenate %108, %107, %108 in 1 : vector<6x1x16xf32>, vector<6x4x16xf32>, vector<6x1x16xf32> -> vector<6x6x16xf32>
    %c0_63 = arith.constant 0 : index
    %c0_64 = arith.constant 0 : index
    %c0_65 = arith.constant 0 : index
    %110 = vector.load %arg15[%c0_63, %c0_64, %c0_65] : memref<6x6x16xf32, #tpu.memory_space<vmem>>, vector<6x6x16xf32>
    tpu.vector_store %arg15[%c0_63, %c0_64, %c0_65], %109 {strides = array<i32>} : memref<6x6x16xf32, #tpu.memory_space<vmem>>, vector<6x6x16xf32>,
    %c0_66 = arith.constant 0 : index
    %c0_67 = arith.constant 0 : index
    %c0_68 = arith.constant 0 : index
    %c0_69 = arith.constant 0 : index
    %111 = vector.load %arg6[%c0_66, %c0_67, %c0_68, %c0_69] : memref<1x4x16x32xbf16, #tpu.memory_space<vmem>>, vector<1x4x16x32xbf16>
    %112 = vector.shape_cast %111 : vector<1x4x16x32xbf16> to vector<4x16x32xbf16>
    %c0_70 = arith.constant 0 : index
    %c0_71 = arith.constant 0 : index
    %c0_72 = arith.constant 0 : index
    %113 = tpu.strided_load %arg15[%c0_70, %c0_71, %c0_72] {strides = array<i32: 1, 2, 1>} : memref<6x6x16xf32, #tpu.memory_space<vmem>>, vector<6x2x16xf32>
    %114 = vector.shape_cast %113 : vector<6x2x16xf32> to vector<12x16xf32>
    %115 = arith.truncf %114 : vector<12x16xf32> to vector<12x16xbf16>
    %116 = vector.extract_strided_slice %112 {offsets = [0, 0, 0], sizes = [1, 16, 32], strides = [1, 1, 1]} : vector<4x16x32xbf16> to vector<1x16x32xbf16>
    %117 = vector.shape_cast %116 : vector<1x16x32xbf16> to vector<16x32xbf16>
    %cst_73 = arith.constant dense<0.000000e+00> : vector<12x32xf32>
    %118 = tpu.matmul %115, %117, %cst_73 {dimension_numbers = #tpu.dot_dimension_numbers<[1], [0], [0], [1], [0, 0, 1, 1], [], []>} : vector<12x16xbf16>, vector<16x32xbf16>, vector<12x32xf32> -> vector<12x32xf32>
    %c0_74 = arith.constant 0 : index
    %c1_75 = arith.constant 1 : index
    %c0_76 = arith.constant 0 : index
    %119 = tpu.strided_load %arg15[%c0_74, %c1_75, %c0_76] {strides = array<i32: 1, 2, 1>} : memref<6x6x16xf32, #tpu.memory_space<vmem>>, vector<6x2x16xf32>
    %120 = vector.shape_cast %119 : vector<6x2x16xf32> to vector<12x16xf32>
    %121 = arith.truncf %120 : vector<12x16xf32> to vector<12x16xbf16>
    %122 = vector.extract_strided_slice %112 {offsets = [1, 0, 0], sizes = [1, 16, 32], strides = [1, 1, 1]} : vector<4x16x32xbf16> to vector<1x16x32xbf16>
    %123 = vector.shape_cast %122 : vector<1x16x32xbf16> to vector<16x32xbf16>
    %cst_77 = arith.constant dense<0.000000e+00> : vector<12x32xf32>
    %124 = tpu.matmul %121, %123, %cst_77 {dimension_numbers = #tpu.dot_dimension_numbers<[1], [0], [0], [1], [0, 0, 1, 1], [], []>} : vector<12x16xbf16>, vector<16x32xbf16>, vector<12x32xf32> -> vector<12x32xf32>
    %125 = arith.addf %118, %124 : vector<12x32xf32>
    %c0_78 = arith.constant 0 : index
    %c2_79 = arith.constant 2 : index
    %c0_80 = arith.constant 0 : index
    %126 = tpu.strided_load %arg15[%c0_78, %c2_79, %c0_80] {strides = array<i32: 1, 2, 1>} : memref<6x6x16xf32, #tpu.memory_space<vmem>>, vector<6x2x16xf32>
    %127 = vector.shape_cast %126 : vector<6x2x16xf32> to vector<12x16xf32>
    %128 = arith.truncf %127 : vector<12x16xf32> to vector<12x16xbf16>
    %129 = vector.extract_strided_slice %112 {offsets = [2, 0, 0], sizes = [1, 16, 32], strides = [1, 1, 1]} : vector<4x16x32xbf16> to vector<1x16x32xbf16>
    %130 = vector.shape_cast %129 : vector<1x16x32xbf16> to vector<16x32xbf16>
    %cst_81 = arith.constant dense<0.000000e+00> : vector<12x32xf32>
    %131 = tpu.matmul %128, %130, %cst_81 {dimension_numbers = #tpu.dot_dimension_numbers<[1], [0], [0], [1], [0, 0, 1, 1], [], []>} : vector<12x16xbf16>, vector<16x32xbf16>, vector<12x32xf32> -> vector<12x32xf32>
    %132 = arith.addf %125, %131 : vector<12x32xf32>
    %c0_82 = arith.constant 0 : index
    %c3_83 = arith.constant 3 : index
    %c0_84 = arith.constant 0 : index
    %133 = tpu.strided_load %arg15[%c0_82, %c3_83, %c0_84] {strides = array<i32: 1, 2, 1>} : memref<6x6x16xf32, #tpu.memory_space<vmem>>, vector<6x2x16xf32>
    %134 = vector.shape_cast %133 : vector<6x2x16xf32> to vector<12x16xf32>
    %135 = arith.truncf %134 : vector<12x16xf32> to vector<12x16xbf16>
    %136 = vector.extract_strided_slice %112 {offsets = [3, 0, 0], sizes = [1, 16, 32], strides = [1, 1, 1]} : vector<4x16x32xbf16> to vector<1x16x32xbf16>
    %137 = vector.shape_cast %136 : vector<1x16x32xbf16> to vector<16x32xbf16>
    %cst_85 = arith.constant dense<0.000000e+00> : vector<12x32xf32>
    %138 = tpu.matmul %135, %137, %cst_85 {dimension_numbers = #tpu.dot_dimension_numbers<[1], [0], [0], [1], [0, 0, 1, 1], [], []>} : vector<12x16xbf16>, vector<16x32xbf16>, vector<12x32xf32> -> vector<12x32xf32>
    %139 = arith.addf %132, %138 : vector<12x32xf32>
    %c0_86 = arith.constant 0 : index
    %c0_87 = arith.constant 0 : index
    %c0_88 = arith.constant 0 : index
    %140 = vector.load %arg7[%c0_86, %c0_87, %c0_88] : memref<1x1x32xf32, #tpu.memory_space<vmem>>, vector<1x1x32xf32>
    %141 = vector.shape_cast %140 : vector<1x1x32xf32> to vector<1x32xf32>
    %c0_89 = arith.constant 0 : index
    %c0_90 = arith.constant 0 : index
    %c0_91 = arith.constant 0 : index
    %142 = vector.load %arg8[%c0_89, %c0_90, %c0_91] : memref<1x1x32xf32, #tpu.memory_space<vmem>>, vector<1x1x32xf32>
    %143 = vector.shape_cast %142 : vector<1x1x32xf32> to vector<1x32xf32>
    %144 = vector.shape_cast %139 : vector<12x32xf32> to vector<3x4x32xf32>
    %cst_92 = arith.constant dense<0.000000e+00> : vector<3x32xf32>
    %145 = vector.multi_reduction <add>, %144, %cst_92 [1] : vector<3x4x32xf32> to vector<3x32xf32>
    %146 = vector.shape_cast %145 : vector<3x32xf32> to vector<3x1x32xf32>
    %cst_93 = arith.constant 4.000000e+00 : f32
    %147 = vector.broadcast %cst_93 : f32 to vector<3x1x32xf32>
    %148 = arith.divf %146, %147 : vector<3x1x32xf32>
    %149 = vector.broadcast %148 : vector<3x1x32xf32> to vector<3x4x32xf32>
    %150 = arith.subf %144, %149 : vector<3x4x32xf32>
    %151 = arith.mulf %150, %150 : vector<3x4x32xf32>
    %cst_94 = arith.constant dense<0.000000e+00> : vector<3x32xf32>
    %152 = vector.multi_reduction <add>, %151, %cst_94 [1] : vector<3x4x32xf32> to vector<3x32xf32>
    %153 = vector.shape_cast %152 : vector<3x32xf32> to vector<3x1x32xf32>
    %cst_95 = arith.constant 4.000000e+00 : f32
    %154 = vector.broadcast %cst_95 : f32 to vector<3x1x32xf32>
    %155 = arith.divf %153, %154 : vector<3x1x32xf32>
    %156 = vector.broadcast %148 : vector<3x1x32xf32> to vector<3x4x32xf32>
    %157 = arith.subf %144, %156 : vector<3x4x32xf32>
    %cst_96 = arith.constant 9.99999974E-6 : f32
    %158 = vector.broadcast %cst_96 : f32 to vector<3x1x32xf32>
    %159 = arith.addf %155, %158 : vector<3x1x32xf32>
    %160 = math.rsqrt %159 : vector<3x1x32xf32>
    %161 = vector.broadcast %160 : vector<3x1x32xf32> to vector<3x4x32xf32>
    %162 = arith.mulf %157, %161 : vector<3x4x32xf32>
    %163 = vector.shape_cast %141 : vector<1x32xf32> to vector<1x1x32xf32>
    %164 = vector.broadcast %163 : vector<1x1x32xf32> to vector<3x4x32xf32>
    %165 = arith.mulf %162, %164 : vector<3x4x32xf32>
    %166 = vector.shape_cast %143 : vector<1x32xf32> to vector<1x1x32xf32>
    %167 = vector.broadcast %166 : vector<1x1x32xf32> to vector<3x4x32xf32>
    %168 = arith.addf %165, %167 : vector<3x4x32xf32>
    %cst_97 = arith.constant 0.000000e+00 : f32
    %169 = vector.broadcast %cst_97 : f32 to vector<3x4x32xf32>
    %170 = arith.cmpf ogt, %168, %169 : vector<3x4x32xf32>
    %cst_98 = arith.constant 2.000000e-01 : f32
    %171 = vector.broadcast %cst_98 : f32 to vector<3x4x32xf32>
    %172 = arith.mulf %171, %168 : vector<3x4x32xf32>
    %173 = arith.select %170, %168, %172 : vector<3x4x32xi1>, vector<3x4x32xf32>
    %174 = vector.shape_cast %173 : vector<3x4x32xf32> to vector<12x32xf32>
    %175 = vector.shape_cast %174 : vector<12x32xf32> to vector<6x2x32xf32>
    %c0_99 = arith.constant 0 : index
    %c0_100 = arith.constant 0 : index
    %c0_101 = arith.constant 0 : index
    %c0_102 = arith.constant 0 : index
    %176 = vector.load %arg9[%c0_99, %c0_100, %c0_101, %c0_102] : memref<1x2x32x64xbf16, #tpu.memory_space<vmem>>, vector<1x2x32x64xbf16>
    %177 = vector.shape_cast %176 : vector<1x2x32x64xbf16> to vector<2x32x64xbf16>
    %178 = vector.extract_strided_slice %175 {offsets = [0, 0, 0], sizes = [6, 1, 32], strides = [1, 1, 1]} : vector<6x2x32xf32> to vector<6x1x32xf32>
    %179 = vector.shape_cast %178 : vector<6x1x32xf32> to vector<6x32xf32>
    %180 = arith.truncf %179 : vector<6x32xf32> to vector<6x32xbf16>
    %181 = vector.extract_strided_slice %177 {offsets = [0, 0, 0], sizes = [1, 32, 64], strides = [1, 1, 1]} : vector<2x32x64xbf16> to vector<1x32x64xbf16>
    %182 = vector.shape_cast %181 : vector<1x32x64xbf16> to vector<32x64xbf16>
    %cst_103 = arith.constant dense<0.000000e+00> : vector<6x64xf32>
    %183 = tpu.matmul %180, %182, %cst_103 {dimension_numbers = #tpu.dot_dimension_numbers<[1], [0], [0], [1], [0, 0, 1, 1], [], []>} : vector<6x32xbf16>, vector<32x64xbf16>, vector<6x64xf32> -> vector<6x64xf32>
    %184 = vector.extract_strided_slice %175 {offsets = [0, 1, 0], sizes = [6, 1, 32], strides = [1, 1, 1]} : vector<6x2x32xf32> to vector<6x1x32xf32>
    %185 = vector.shape_cast %184 : vector<6x1x32xf32> to vector<6x32xf32>
    %186 = arith.truncf %185 : vector<6x32xf32> to vector<6x32xbf16>
    %187 = vector.extract_strided_slice %177 {offsets = [1, 0, 0], sizes = [1, 32, 64], strides = [1, 1, 1]} : vector<2x32x64xbf16> to vector<1x32x64xbf16>
    %188 = vector.shape_cast %187 : vector<1x32x64xbf16> to vector<32x64xbf16>
    %cst_104 = arith.constant dense<0.000000e+00> : vector<6x64xf32>
    %189 = tpu.matmul %186, %188, %cst_104 {dimension_numbers = #tpu.dot_dimension_numbers<[1], [0], [0], [1], [0, 0, 1, 1], [], []>} : vector<6x32xbf16>, vector<32x64xbf16>, vector<6x64xf32> -> vector<6x64xf32>
    %190 = arith.addf %183, %189 : vector<6x64xf32>
    %191 = vector.shape_cast %190 : vector<6x64xf32> to vector<6x1x64xf32>
    %cst_105 = arith.constant dense<0.000000e+00> : vector<6x64xf32>
    %192 = vector.multi_reduction <add>, %191, %cst_105 [1] : vector<6x1x64xf32> to vector<6x64xf32>
    %cst_106 = arith.constant 1.000000e+00 : f32
    %193 = vector.broadcast %cst_106 : f32 to vector<6x64xf32>
    %194 = arith.divf %192, %193 : vector<6x64xf32>
    %c0_107 = arith.constant 0 : index
    %c0_108 = arith.constant 0 : index
    %c0_109 = arith.constant 0 : index
    %195 = vector.load %arg10[%c0_107, %c0_108, %c0_109] : memref<1x64x64xf32, #tpu.memory_space<vmem>>, vector<1x64x64xf32>
    %196 = vector.shape_cast %195 : vector<1x64x64xf32> to vector<64x64xf32>
    %cst_110 = arith.constant dense<0.000000e+00> : vector<6x64xf32>
    %197 = tpu.matmul %194, %196, %cst_110 {dimension_numbers = #tpu.dot_dimension_numbers<[1], [0], [0], [1], [0, 0, 1, 1], [], []>} : vector<6x64xf32>, vector<64x64xf32>, vector<6x64xf32> -> vector<6x64xf32>
    %c0_111 = arith.constant 0 : index
    %c0_112 = arith.constant 0 : index
    %c0_113 = arith.constant 0 : index
    %198 = vector.load %arg11[%c0_111, %c0_112, %c0_113] : memref<1x1x64xf32, #tpu.memory_space<vmem>>, vector<1x1x64xf32>
    %199 = vector.shape_cast %198 : vector<1x1x64xf32> to vector<1x64xf32>
    %200 = vector.broadcast %199 : vector<1x64xf32> to vector<6x64xf32>
    %201 = arith.addf %197, %200 : vector<6x64xf32>
    %202 = tpu.concatenate %194, %201 in 1 : vector<6x64xf32>, vector<6x64xf32> -> vector<6x128xf32>
    %c0_114 = arith.constant 0 : index
    %c0_115 = arith.constant 0 : index
    %c0_116 = arith.constant 0 : index
    %203 = vector.load %arg12[%c0_114, %c0_115, %c0_116] : memref<1x6x128xf32, #tpu.memory_space<vmem>>, vector<1x6x128xf32>
    %204 = vector.shape_cast %203 : vector<1x6x128xf32> to vector<6x128xf32>
    %205 = vector.shape_cast %202 : vector<6x128xf32> to vector<1x6x128xf32>
    tpu.vector_store %arg12[%c0_114, %c0_115, %c0_116], %205 {strides = array<i32>} : memref<1x6x128xf32, #tpu.memory_space<vmem>>, vector<1x6x128xf32>,
    return
  }
  func.func @transform_0(%arg0: i32) -> (i32, i32, i32, i32) {
    %c0_i32 = arith.constant 0 : i32
    %c0_i32_0 = arith.constant 0 : i32
    %c0_i32_1 = arith.constant 0 : i32
    %c0_i32_2 = arith.constant 0 : i32
    return %arg0, %c0_i32, %c0_i32_0, %c0_i32_1 : i32, i32, i32, i32
  }
  func.func @transform_1(%arg0: i32) -> (i32, i32, i32, i32) {
    %c0_i32 = arith.constant 0 : i32
    %c0_i32_0 = arith.constant 0 : i32
    %c0_i32_1 = arith.constant 0 : i32
    %c0_i32_2 = arith.constant 0 : i32
    return %arg0, %c0_i32, %c0_i32_0, %c0_i32_1 : i32, i32, i32, i32
  }
  func.func @transform_2(%arg0: i32) -> (i32, i32, i32, i32) {
    %c0_i32 = arith.constant 0 : i32
    %c0_i32_0 = arith.constant 0 : i32
    %c0_i32_1 = arith.constant 0 : i32
    %c0_i32_2 = arith.constant 0 : i32
    return %arg0, %c0_i32, %c0_i32_0, %c0_i32_1 : i32, i32, i32, i32
  }
  func.func @transform_3(%arg0: i32) -> (i32, i32, i32) {
    %c0_i32 = arith.constant 0 : i32
    %c0_i32_0 = arith.constant 0 : i32
    %c0_i32_1 = arith.constant 0 : i32
    return %arg0, %c0_i32, %c0_i32_0 : i32, i32, i32
  }
  func.func @transform_4(%arg0: i32) -> (i32, i32, i32) {
    %c0_i32 = arith.constant 0 : i32
    %c0_i32_0 = arith.constant 0 : i32
    %c0_i32_1 = arith.constant 0 : i32
    return %arg0, %c0_i32, %c0_i32_0 : i32, i32, i32
  }
  func.func @transform_5(%arg0: i32) -> (i32, i32, i32, i32) {
    %c0_i32 = arith.constant 0 : i32
    %c0_i32_0 = arith.constant 0 : i32
    %c0_i32_1 = arith.constant 0 : i32
    %c0_i32_2 = arith.constant 0 : i32
    return %arg0, %c0_i32, %c0_i32_0, %c0_i32_1 : i32, i32, i32, i32
  }
  func.func @transform_6(%arg0: i32) -> (i32, i32, i32) {
    %c0_i32 = arith.constant 0 : i32
    %c0_i32_0 = arith.constant 0 : i32
    %c0_i32_1 = arith.constant 0 : i32
    return %arg0, %c0_i32, %c0_i32_0 : i32, i32, i32
  }
  func.func @transform_7(%arg0: i32) -> (i32, i32, i32) {
    %c0_i32 = arith.constant 0 : i32
    %c0_i32_0 = arith.constant 0 : i32
    %c0_i32_1 = arith.constant 0 : i32
    return %arg0, %c0_i32, %c0_i32_0 : i32, i32, i32
  }
  func.func @transform_8(%arg0: i32) -> (i32, i32, i32, i32) {
    %c0_i32 = arith.constant 0 : i32
    %c0_i32_0 = arith.constant 0 : i32
    %c0_i32_1 = arith.constant 0 : i32
    %c0_i32_2 = arith.constant 0 : i32
    return %arg0, %c0_i32, %c0_i32_0, %c0_i32_1 : i32, i32, i32, i32
  }
  func.func @transform_9(%arg0: i32) -> (i32, i32, i32) {
    %c0_i32 = arith.constant 0 : i32
    %c0_i32_0 = arith.constant 0 : i32
    %c0_i32_1 = arith.constant 0 : i32
    return %arg0, %c0_i32, %c0_i32_0 : i32, i32, i32
  }
  func.func @transform_10(%arg0: i32) -> (i32, i32, i32) {
    %c0_i32 = arith.constant 0 : i32
    %c0_i32_0 = arith.constant 0 : i32
    %c0_i32_1 = arith.constant 0 : i32
    return %arg0, %c0_i32, %c0_i32_0 : i32, i32, i32
  }
  func.func @transform_11(%arg0: i32) -> (i32, i32, i32) {
    %c0_i32 = arith.constant 0 : i32
    %c0_i32_0 = arith.constant 0 : i32
    %c0_i32_1 = arith.constant 0 : i32
    return %arg0, %c0_i32, %c0_i32_0 : i32, i32, i32
  }
}

</mosaic_0001>

<bundles_post_ra>
// kernel: base_model_forward.1
= control target key start
LH: loop header
LB: loop body
LE: loop exit
PB: predicated region body
PF: predicated region fallthrough
CT: control target
= control target key end

     0   :  { %16 = vsyncpa [#allocation6], 0  ;;  %s3562_s0 = inlined_call_operand.vmem [shape: f32[2,6,16,4], index: 0, kind: input, shape index: {}]   ;;  %s3563_s1 = inlined_call_operand.vmem [shape: bf16[2,4,4,8], index: 1, kind: input, shape index: {}]   ;;  %s3564_s2 = inlined_call_operand.vmem [shape: bf16[2,4,8,16], index: 2, kind: input, shape index: {}]   ;;  %s3565_s3 = inlined_call_operand.vmem [shape: f32[2,1,16], index: 3, kind: input, shape index: {}]   ;;  %s3566_s4 = inlined_call_operand.hbm [shape: f32[2,1,16], index: 4, kind: input, shape index: {}]   ;;  %s3567_s5 = inlined_call_operand.vmem [shape: bf16[2,4,16,32], index: 5, kind: input, shape index: {}]   ;;  %s3568_s6 = inlined_call_operand.vmem [shape: f32[2,1,32], index: 6, kind: input, shape index: {}]   ;;  %s3569_s7 = inlined_call_operand.hbm [shape: f32[2,1,32], index: 7, kind: input, shape index: {}]   ;;  %s3570_s8 = inlined_call_operand.vmem [shape: bf16[2,2,32,64], index: 8, kind: input, shape index: {}]   ;;  %s3571_s9 = inlined_call_operand.vmem [shape: f32[2,64,64], index: 9, kind: input, shape index: {}]   ;;  %s3572_s10 = inlined_call_operand.vmem [shape: f32[2,1,64], index: 10, kind: input, shape index: {}]   ;;  %s3573_s11 = inlined_call_operand.vmem [shape: f32[2,6,128], index: 11, kind: output, shape index: {}]  }
   0x1   :  { %18 = vsyncpa [#allocation6 + $0x1], 0 }
   0x2   :  { %19 = vsyncpa [#allocation8], 0 }
   0x3   :  { %21 = vsyncpa [#allocation8 + $0x1], 0  ;;  %s3115_s17 = smov 0   ;;  %s3117_s18 = smov 0  }
   0x4   :  { %s3119_s19 = smov 0   ;;  %s3121_s20 = smov 0  }
   0x5 LB: > { %s3134_s21 = sadd.s32 4294967295, %s3046_s20   ;;  %s3137_s22 = sadd.s32 1, %s3046_s20   ;;  %s3046_s20 = sphi %s3121_s20, %s3587_s20   ;;  %s3042_s19 = sphi %s3119_s19, %s3586_s19   ;;  %s3038_s18 = sphi %s3117_s18, %s3585_s18   ;;  %s3034_s17 = sphi %s3115_s17, %s3584_s17  }
   0x6   : > { %s135_s23 = ssub.s32 %s3046_s20, %s3137_s22  ;;  %s138_s24 = sadd.s32 1, %s3042_s19 }
   0x7   : > { %p136_p0 = scmp.eq.s32.totalorder %s135_s23, 0  ;;  %p145_p1 = scmp.ne.s32.totalorder %s3042_s19, %s3038_s18 }
   0x8   : > { %p146_p2 = scmp.eq.s32.totalorder %s3046_s20, 0  ;;  %p151_p3 = scmp.ne.s32.totalorder %s3038_s18, %s3034_s17 }
   0x9   : > { %s3147_s25 = scalar_select %p136_p0, %s3042_s19, %s138_s24  }
   0xa   : > { %p147_p4 = por %p146_p2, %p145_p1  ;;  %p152_p5 = scmp.eq.s32.totalorder %s3134_s21, 0 }
   0xb   : > { %p2890_p6 = scmp.lt.s32.totalorder %s3046_s20, 2  ;;  %s3156_s27 = sand.u32 1, %s3042_s19  }
   0xc   : > { %p3151_p7 = por %p152_p5, %p151_p3  ;;  %s3574_s28 = sshll.u32 %s3046_s20, 4 }
   0xd   : > { %s390_s29 = scalar_lea.vmem [#allocation5], %s3156_s27  ;;  %s3165_s14 = scalar_lea.hbm %s3566_s4, %s3574_s28 }
   0xe   : > { %s3576_s26 = scalar_select %p3151_p7, 1, 0 }
   0xf   : > { %s397_s30 = sshll.u32 %s390_s29, 4  ;;  %p3169_p8 = pnand %p2890_p6, %p147_p4  ;;  %s3167_s30 = int_to_ptr.vmem [resolvable:$true] %s397_s30 }
  0x10   : > { %s388_s16 = scalar_lea.sflag [#allocation6], %s3156_s27  ;;  %s2948_s17 = scalar_lea.hbm %s3165_s14, 16 }
  0x11   : > { %p2949_p11 = scmp.ne.s32.totalorder %s3165_s14, %s2948_s17  ;;  %p2950_p12 = pneg %p3169_p8 }
  0x12   : > { %s2953_s29 = scalar_lea.hbm %s3566_s4, 32  ;;  %p2954_p1 = scmp.lt.u32.totalorder %s3165_s14, %s3566_s4 }
  0x13   : > { %p2951_p13 = pnand %p2950_p12, %p2949_p11  ;;  %p2955_p2 = scmp.lt.u32.totalorder %s2953_s29, %s2948_s17 }
  0x14   : > { %p2957_p4 = scmp.lt.u32.totalorder %s2948_s17, %s3165_s14 }
  0x15   : > { %p2952_p0 = pneg %p2951_p13  ;;  %p2956_p3 = por %p2955_p2, %p2954_p1 }
  0x17   : > { %p2958_p5 = por %p2957_p4, %p2956_p3 }
  0x19   : > { %p2959_p6 = pnand %p2958_p5, %p2952_p0 }
  0x1b   : > { %2962 = shalt.err (!%p2959_p6)
}
  0x1c   : > { %s2963_s28 = scalar_lea.vmem %s3167_s30, 16  ;;  %s3048_s23 = smov [#allocation5]  }
  0x1d   : > { %p2964_p11 = scmp.ne.s32.totalorder %s3167_s30, %s2963_s28  ;;  %s2968_s24 = sshll.u32 %s3048_s23, 4  ;;  %s2969_s24 = int_to_ptr.vmem [resolvable:$false] %s2968_s24 }
  0x1e   : > { %s2970_s12 = scalar_lea.vmem %s2969_s24, 32  ;;  %p2971_p10 = scmp.lt.s32.totalorder %s3167_s30, %s2969_s24 }
  0x1f   : > { %p2966_p13 = pnand %p2964_p11, %p2950_p12  ;;  %p2972_p1 = scmp.lt.s32.totalorder %s2970_s12, %s2963_s28 }
  0x21   : > { %p2967_p9 = pneg %p2966_p13  ;;  %p2973_p2 = por %p2972_p1, %p2971_p10 }
  0x23   : > { %p2974_p3 = pnand %p2973_p2, %p2967_p9 }
  0x25   : > { %2977 = shalt.err (!%p2974_p3)
}
  0x26   : > { %2886 = dma.hbm_to_vmem [thread:$0]  (!%p3169_p8), %s3165_s14, 16, %s3167_s30, %s388_s16  }
  0x27   : > { %p3578_p0 = scmp.lt.s32.totalorder %s3046_s20, 3  ;;  %p3579_p4 = scmp.ge.s32.totalorder %s3046_s20, 1 }
  0x28   : > { %s3581_s28 = sshll.u32 %s3046_s20, 4  ;;  %s421_s24 = scalar_lea.vmem [#allocation7], %s3156_s27 }
  0x29   : > { %p3205_p5 = pnand %p3579_p4, %p3578_p0  ;;  %s3214_s23 = scalar_lea.hbm %s3569_s7, %s3581_s28 }
  0x2a   : > { %s428_s12 = sshll.u32 %s421_s24, 4  ;;  %s419_s30 = scalar_lea.sflag [#allocation8], %s3156_s27  ;;  %s429_s12 = int_to_ptr.vmem [resolvable:$true] %s428_s12 }
  0x2b   : > { %s3580_s17 = scalar_select %p3205_p5, 1, 0 }
  0x2c   : > { %s2978_s14 = scalar_lea.hbm %s3214_s23, 16  ;;  %s2983_s29 = scalar_lea.hbm %s3569_s7, 32 }
  0x2d   : > { %p2979_p9 = scmp.ne.s32.totalorder %s3214_s23, %s2978_s14  ;;  %p2984_p11 = scmp.lt.u32.totalorder %s3214_s23, %s3569_s7 }
  0x2e   : > { %p2985_p13 = scmp.lt.u32.totalorder %s2983_s29, %s2978_s14  ;;  %p2987_p2 = scmp.lt.u32.totalorder %s2978_s14, %s3214_s23 }
  0x2f   : > { %p2981_p10 = pnand %p2979_p9, %p2950_p12 }
  0x30   : > { %p2986_p1 = por %p2985_p13, %p2984_p11 }
  0x31   : > { %p2982_p6 = pneg %p2981_p10 }
  0x32   : > { %p2988_p3 = por %p2987_p2, %p2986_p1 }
  0x34   : > { %p2989_p0 = pnand %p2988_p3, %p2982_p6 }
  0x36   : > { %2992 = shalt.err (!%p2989_p0)
}
  0x37   : > { %s2993_s27 = scalar_lea.vmem %s429_s12, 16  ;;  %s3049_s24 = smov [#allocation7]  }
  0x38   : > { %p2994_p4 = scmp.ne.s32.totalorder %s429_s12, %s2993_s27  ;;  %s2998_s20 = sshll.u32 %s3049_s24, 4  ;;  %s2999_s20 = int_to_ptr.vmem [resolvable:$false] %s2998_s20 }
  0x39   : > { %s3000_s16 = scalar_lea.vmem %s2999_s20, 32  ;;  %p3001_p7 = scmp.lt.s32.totalorder %s429_s12, %s2999_s20 }
  0x3a   : > { %p2996_p9 = pnand %p2994_p4, %p2950_p12  ;;  %p3002_p5 = scmp.lt.s32.totalorder %s3000_s16, %s2993_s27 }
  0x3c   : > { %p2997_p10 = pneg %p2996_p9  ;;  %p3003_p11 = por %p3002_p5, %p3001_p7 }
  0x3e   : > { %p3004_p13 = pnand %p3003_p11, %p2997_p10 }
  0x40   : > { %3007 = shalt.err (!%p3004_p13)
}
  0x41   : > { %2889 = dma.hbm_to_vmem [thread:$0]  (!%p3169_p8), %s3214_s23, 16, %s429_s12, %s419_s30  }
  0x42   : > { %p3582_p6 = scmp.ne.s32.totalorder %s3580_s17, 0 }
  0x43   : > { %s3240_s14 = sand.u32 (!%p3582_p6), 1, %s3038_s18   ;;  %p3583_p12 = scmp.ne.s32.totalorder (!%p3582_p6), %s3576_s26, 0 }
  0x44   : > { %459 = sbr.rel (%p3582_p6) target bundleno = 1626 (0x65a), region = 64  ;;  %s462_s29 = scalar_lea.sflag (!%p3582_p6), [#allocation6], %s3240_s14 }
  0x45   : > { %s464_s28 = scalar_lea.vmem (!%p3582_p6), [#allocation5], %s3240_s14 }
  0x4b   : > { %3025 = dma.done.wait (%p3583_p12), %s462_s29, 16  }
  0x4c   : > { %3027 = vsyncadd (%p3583_p12), %s462_s29, 4294967280  ;;  %s470_s15 = scalar_lea.sflag [#allocation8], %s3240_s14  ;;  %s472_s23 = scalar_lea.vmem [#allocation7], %s3240_s14 }
  0x4d   : > { %3029 = dma.done.wait (%p3583_p12), %s470_s15, 16  }
  0x4e   : > { %3031 = vsyncadd (%p3583_p12), %s470_s15, 4294967280  ;;  %p552_p7 = scmp.lt.s32.totalorder %s3134_s21, 1  ;;  %v3050_v0 = vmov 0.0   ;;  %vm3051_vm0 = vmmov 0   ;;  %vm731_vm1 = vcmask 1041408   ;;  %vm620_vm2 = vcmask 1040384  }
  0x4f   : > { %2659 = vmatprep.subr.bf16.mxu0 %v3050_v0  ;;  %2661 = vmatprep.mubr.msk.bf16.mxu0 %vm3051_vm0, %v3050_v0  ;;  %vm669_vm3 = vcmask 31744   ;;  %vm672_vm4 = vcmask 25600   ;;  %vm1164_vm5 = vcmask 1043456   ;;  %vm1089_vm8 = vcmask 64512  }
  0x50   : > { %s3589_s21 = smov (!%p552_p7, %s3134_s21), 1  ;;  %vm1091_vm9 = vcmask 58368   ;;  %vm1447_vm14 = vcmask 130048  }
  0x51   : > { %s2878_s17 = smul.u32 96, %s3589_s21  ;;  %s2603_s12 = sshll.u32 %s3589_s21, 3 }
  0x52   : > { %s3268_s13 = scalar_lea.vmem %s3563_s1, %s2603_s12  ;;  %s2604_s16 = sshll.u32 %s3589_s21, 4 }
  0x53   : > { %s3273_s20 = scalar_lea.vmem %s3562_s0, %s2878_s17  ;;  %v690_v1 = vld [vmem:[%s3268_s13 + $0x2] sm:$0x3]  ;;  %v689_v44 = vld [vmem:[%s3268_s13] sm:$0x3]  ;;  %v691_v58 = vld [vmem:[%s3268_s13 + $0x4] sm:$0x3]  ;;  %s3372_s17 = scalar_lea.vmem %s3564_s2, %s2604_s16 }
  0x54   : > { %v596_v2 = vld [vmem:[%s3273_s20] sm:$0xff]  ;;  %v597_v3 = vld [vmem:[%s3273_s20 + $0x8] sm:$0xff]  ;;  %v733_v4 = vsel %vm731_vm1, %v690_v1, 0  ;;  %v598_v5 = vld [vmem:[%s3273_s20 + $0x10] sm:$0xff]  ;;  %v802_v49 = vsel %vm731_vm1, %v689_v44, 0  ;;  %v886_v60 = vsel %vm731_vm1, %v691_v58, 0  ;;  %s569_s16 = scalar_lea.vmem %s3565_s3, %s3589_s21  ;;  %s577_s30 = scalar_lea.vmem %s3568_s6, %s3589_s21 }
  0x55   : > { %v599_v6 = vld [vmem:[%s3273_s20 + $0x18] sm:$0xff]  ;;  %v621_v7 = vrot.slane %v596_v2, 7  ;;  %v622_v8 = vrot.slane %v597_v3, 7  ;;  %v600_v9 = vld [vmem:[%s3273_s20 + $0x20] sm:$0xff]  ;;  %2660 = vmatpush3.bf16.msra.mxu0 %v733_v4  ;;  %v624_v10 = vrot.slane %v598_v5, 7  ;;  %v601_v12 = vld [vmem:[%s3273_s20 + $0x28] sm:$0xff] }
  0x56   : > { %v625_v11 = vrot.slane %v599_v6, 7  ;;  %v602_v13 = vld [vmem:[%s3273_s20 + $0x30] sm:$0xff]  ;;  %2673 = vmatprep.subr.bf16.mxu0 %v3050_v0  ;;  %v603_v17 = vld [vmem:[%s3273_s20 + $0x38] sm:$0xff]  ;;  %v604_v18 = vld [vmem:[%s3273_s20 + $0x40] sm:$0xff]  ;;  %v627_v23 = vrot.slane %v600_v9, 7  ;;  %v628_v26 = vrot.slane %v601_v12, 7 }
  0x57   : > { %v623_v14 = vsel %vm620_vm2, %v621_v7, %v622_v8  ;;  %v657_v15 = vsel %vm620_vm2, 0.0, %v621_v7  ;;  %v663_v16 = vsel %vm620_vm2, %v622_v8, 0.0  ;;  %v605_v19 = vld [vmem:[%s3273_s20 + $0x48] sm:$0xff]  ;;  %v658_v21 = vsel %vm620_vm2, 0.0, %v624_v10  ;;  %v606_v24 = vld [vmem:[%s3273_s20 + $0x50] sm:$0xff]  ;;  %v607_v25 = vld [vmem:[%s3273_s20 + $0x58] sm:$0xff] }
  0x58   : > { %v626_v20 = vsel %vm620_vm2, %v624_v10, %v625_v11  ;;  %v664_v22 = vsel %vm620_vm2, %v625_v11, 0.0  ;;  %670 = vst.msk [vmem:[#allocation2] sm:$0xff] %vm669_vm3, %v657_v15  ;;  %671 = vst.msk [vmem:[#allocation2 + $0x8] sm:$0xff] %vm669_vm3, %v623_v14  ;;  %v630_v27 = vrot.slane %v602_v13, 7  ;;  %v631_v28 = vrot.slane %v603_v17, 7  ;;  %s2605_s26 = sshll.u32 %s3589_s21, 5 }
  0x59   : > { %673 = vst.msk [vmem:[#allocation2 + $0x10] sm:$0x3] %vm672_vm4, %v663_v16  ;;  %v633_v29 = vrot.slane %v604_v18, 7  ;;  %676 = vst.msk [vmem:[#allocation2 + $0x28] sm:$0x3] %vm672_vm4, %v664_v22  ;;  %v659_v30 = vsel %vm620_vm2, 0.0, %v627_v23  ;;  %v629_v34 = vsel %vm620_vm2, %v627_v23, %v628_v26  ;;  %s3431_s27 = scalar_lea.vmem %s3567_s5, %s2605_s26  ;;  %s3502_s15 = scalar_lea.vmem %s3570_s8, %s2605_s26 }
  0x5a   : > { %674 = vst.msk [vmem:[#allocation2 + $0x18] sm:$0xff] %vm669_vm3, %v658_v21  ;;  %675 = vst.msk [vmem:[#allocation2 + $0x20] sm:$0xff] %vm669_vm3, %v626_v20  ;;  %v634_v31 = vrot.slane %v605_v19, 7  ;;  %v636_v32 = vrot.slane %v606_v24, 7  ;;  %v637_v33 = vrot.slane %v607_v25, 7  ;;  %v632_v35 = vsel %vm620_vm2, %v630_v27, %v631_v28  ;;  %s2607_s14 = sshll.u32 %s3589_s21, 6 }
  0x5b   : > { %v660_v36 = vsel %vm620_vm2, 0.0, %v630_v27  ;;  %677 = vst.msk [vmem:[#allocation2 + $0x30] sm:$0xff] %vm669_vm3, %v659_v30  ;;  %v661_v37 = vsel %vm620_vm2, 0.0, %v633_v29  ;;  %678 = vst.msk [vmem:[#allocation2 + $0x38] sm:$0xff] %vm669_vm3, %v629_v34  ;;  %v665_v41 = vsel %vm620_vm2, %v628_v26, 0.0  ;;  %v666_v42 = vsel %vm620_vm2, %v631_v28, 0.0 }
  0x5c   : > { %680 = vst.msk [vmem:[#allocation2 + $0x48] sm:$0xff] %vm669_vm3, %v660_v36  ;;  %681 = vst.msk [vmem:[#allocation2 + $0x50] sm:$0xff] %vm669_vm3, %v632_v35  ;;  %v635_v38 = vsel %vm620_vm2, %v633_v29, %v634_v31  ;;  %v638_v39 = vsel %vm620_vm2, %v636_v32, %v637_v33  ;;  %v662_v40 = vsel %vm620_vm2, 0.0, %v636_v32  ;;  %v667_v43 = vsel %vm620_vm2, %v634_v31, 0.0  ;;  %v692_v6 = vld [vmem:[%s3268_s13 + $0x6] sm:$0x3] }
  0x5d   : > { %683 = vst.msk [vmem:[#allocation2 + $0x60] sm:$0xff] %vm669_vm3, %v661_v37  ;;  %684 = vst.msk [vmem:[#allocation2 + $0x68] sm:$0xff] %vm669_vm3, %v635_v38  ;;  %v668_v45 = vsel %vm620_vm2, %v637_v33, 0.0  ;;  %v976_v8 = vsel %vm731_vm1, %v692_v6, 0  ;;  %v1104_v24 = vld [vmem:[%s3372_s17 + $0x4] sm:$0xf] }
  0x5e   : > { %686 = vst.msk [vmem:[#allocation2 + $0x78] sm:$0xff] %vm669_vm3, %v662_v40  ;;  %687 = vst.msk [vmem:[#allocation2 + $0x80] sm:$0xff] %vm669_vm3, %v638_v39  ;;  %v3376_v25 = vld [vmem:[%s3372_s17] sm:$0xf]  ;;  %2874 = vmatprep.subr.msk.bf16.mxu1 %vm1164_vm5, %v1104_v24  ;;  %v1166_v26 = vsel %vm1164_vm5, %v1104_v24, 0 }
  0x5f   : > { %679 = vst.msk [vmem:[#allocation2 + $0x40] sm:$0x3] %vm672_vm4, %v665_v41  ;;  %682 = vst.msk [vmem:[#allocation2 + $0x58] sm:$0x3] %vm672_vm4, %v666_v42  ;;  %v708_v46 = vld [vmem:[#allocation2 + $0x1] ss:$2 sm:$0xff]  ;;  %2716 = vmatpush3.bf16.msra.mxu1 %v1166_v26 }
  0x60   : > { %685 = vst.msk [vmem:[#allocation2 + $0x70] sm:$0x3] %vm672_vm4, %v667_v43  ;;  %688 = vst.msk [vmem:[#allocation2 + $0x88] sm:$0x3] %vm672_vm4, %v668_v45  ;;  %v693_v56 = vld [vmem:[#allocation2] ss:$2 sm:$0xff]  ;;  %2875 = vmatprep.subr.msk.bf16.mxu1 %vm1164_vm5, %v3376_v25 }
  0x61   : > { %v710_v47 = vld [vmem:[#allocation2 + $0x19] ss:$2 sm:$0xff]  ;;  %v695_v57 = vld [vmem:[#allocation2 + $0x18] ss:$2 sm:$0xff]  ;;  %v1105_v26 = vld [vmem:[%s3372_s17 + $0x8] sm:$0xf] }
  0x62   : > { %v719_v48 = vpack.c.bf16 %v710_v47, %v708_v46  ;;  %v712_v50 = vld [vmem:[#allocation2 + $0x31] ss:$2 sm:$0xff]  ;;  %v704_v59 = vpack.c.bf16 %v695_v57, %v693_v56  ;;  %v697_v61 = vld [vmem:[#allocation2 + $0x30] ss:$2 sm:$0xff] }
  0x63   : > { %v714_v51 = vld [vmem:[#allocation2 + $0x49] ss:$2 sm:$0xff]  ;;  %v699_v62 = vld [vmem:[#allocation2 + $0x48] ss:$2 sm:$0xff] }
  0x64   : > { %2662 = vmatmul.mubr.msk.bf16.vlgmr.msra.gmra.mrb[0].mxu0 %vm669_vm3, %v719_v48  ;;  %v720_v52 = vpack.c.bf16 %v714_v51, %v712_v50  ;;  %v716_v53 = vld [vmem:[#allocation2 + $0x61] ss:$2 sm:$0xff]  ;;  %v705_v63 = vpack.c.bf16 %v699_v62, %v697_v61  ;;  %v701_v1 = vld [vmem:[#allocation2 + $0x60] ss:$2 sm:$0xff] }
  0x65   : > { %2674 = vmatpush3.bf16.msra.mxu0 %v802_v49  ;;  %2665 = vmatprep.mubr.msk.bf16.mxu0 %vm3051_vm0, %v3050_v0  ;;  %v718_v54 = vld [vmem:[#allocation2 + $0x79] ss:$2 sm:$0xff]  ;;  %v703_v2 = vld [vmem:[#allocation2 + $0x78] ss:$2 sm:$0xff] }
  0x66   : > { %2687 = vmatprep.subr.bf16.mxu0 %v3050_v0  ;;  %v721_v55 = vpack.c.bf16 %v718_v54, %v716_v53  ;;  %v706_v3 = vpack.c.bf16 %v703_v2, %v701_v1  ;;  %v862_v4 = vld [vmem:[#allocation2 + $0x2] ss:$2 sm:$0xff]  ;;  %v866_v9 = vld [vmem:[#allocation2 + $0x32] ss:$2 sm:$0xff]  ;;  %v952_v15 = vld [vmem:[#allocation2 + $0x3] ss:$2 sm:$0xff] }
  0x67   : > { %v864_v5 = vld [vmem:[#allocation2 + $0x1a] ss:$2 sm:$0xff]  ;;  %v868_v10 = vld [vmem:[#allocation2 + $0x4a] ss:$2 sm:$0xff]  ;;  %v954_v16 = vld [vmem:[#allocation2 + $0x1b] ss:$2 sm:$0xff] }
  0x68   : > { %v873_v7 = vpack.c.bf16 %v864_v5, %v862_v4  ;;  %v874_v11 = vpack.c.bf16 %v868_v10, %v866_v9  ;;  %v870_v12 = vld [vmem:[#allocation2 + $0x62] ss:$2 sm:$0xff]  ;;  %v963_v17 = vpack.c.bf16 %v954_v16, %v952_v15  ;;  %v956_v18 = vld [vmem:[#allocation2 + $0x33] ss:$2 sm:$0xff]  ;;  %v960_v21 = vld [vmem:[#allocation2 + $0x63] ss:$2 sm:$0xff] }
  0x69   : > { %v872_v13 = vld [vmem:[#allocation2 + $0x7a] ss:$2 sm:$0xff]  ;;  %v958_v19 = vld [vmem:[#allocation2 + $0x4b] ss:$2 sm:$0xff]  ;;  %v962_v22 = vld [vmem:[#allocation2 + $0x7b] ss:$2 sm:$0xff] }
  0x6a   : > { %v875_v14 = vpack.c.bf16 %v872_v13, %v870_v12  ;;  %v964_v20 = vpack.c.bf16 %v958_v19, %v956_v18  ;;  %v965_v23 = vpack.c.bf16 %v962_v22, %v960_v21 }
  0x6c   : > { %2666 = vmatmul.mubr.msk.bf16.gmra.mrb[4].mxu0 %vm669_vm3, %v720_v52 }
  0x6d   : > { %2669 = vmatprep.mubr.msk.bf16.mxu0 %vm3051_vm0, %v3050_v0 }
  0x74   : > { %2670 = vmatmul.mubr.msk.bf16.gmra.mrb[8].mxu0 %vm669_vm3, %v721_v55 }
  0x75   : > { %2675 = vmatprep.mubr.msk.bf16.mxu0 %vm3051_vm0, %v3050_v0 }
  0x7c   : > { %2676 = vmatmul.mubr.msk.bf16.vlgmr.msra.gmra.mrb[0].mxu0 %vm669_vm3, %v704_v59 }
  0x7d   : > { %2688 = vmatpush3.bf16.msra.mxu0 %v886_v60  ;;  %2679 = vmatprep.mubr.msk.bf16.mxu0 %vm3051_vm0, %v3050_v0 }
  0x7e   : > { %2701 = vmatprep.subr.bf16.mxu0 %v3050_v0 }
  0x84   : > { %2680 = vmatmul.mubr.msk.bf16.gmra.mrb[4].mxu0 %vm669_vm3, %v705_v63 }
  0x85   : > { %2683 = vmatprep.mubr.msk.bf16.mxu0 %vm3051_vm0, %v3050_v0 }
  0x8c   : > { %2684 = vmatmul.mubr.msk.bf16.gmra.mrb[8].mxu0 %vm669_vm3, %v706_v3 }
  0x8d   : > { %2689 = vmatprep.mubr.msk.bf16.mxu0 %vm3051_vm0, %v3050_v0 }
  0x94   : > { %2690 = vmatmul.mubr.msk.bf16.vlgmr.msra.gmra.mrb[0].mxu0 %vm669_vm3, %v873_v7 }
  0x95   : > { %2702 = vmatpush3.bf16.msra.mxu0 %v976_v8  ;;  %2693 = vmatprep.mubr.msk.bf16.mxu0 %vm3051_vm0, %v3050_v0 }
  0x9c   : > { %2694 = vmatmul.mubr.msk.bf16.gmra.mrb[4].mxu0 %vm669_vm3, %v874_v11 }
  0x9d   : > { %2697 = vmatprep.mubr.msk.bf16.mxu0 %vm3051_vm0, %v3050_v0 }
  0xa4   : > { %2698 = vmatmul.mubr.msk.bf16.gmra.mrb[8].mxu0 %vm669_vm3, %v875_v14 }
  0xa5   : > { %2703 = vmatprep.mubr.msk.bf16.mxu0 %vm3051_vm0, %v3050_v0 }
  0xac   : > { %2704 = vmatmul.mubr.msk.bf16.vlgmr.msra.gmra.mrb[0].mxu0 %vm669_vm3, %v963_v17 }
  0xad   : > { %2707 = vmatprep.mubr.msk.bf16.mxu0 %vm3051_vm0, %v3050_v0 }
  0xb4   : > { %2708 = vmatmul.mubr.msk.bf16.gmra.mrb[4].mxu0 %vm669_vm3, %v964_v20 }
  0xb5   : > { %2711 = vmatprep.mubr.msk.bf16.mxu0 %vm3051_vm0, %v3050_v0 }
  0xbc   : > { %2712 = vmatmul.mubr.msk.bf16.gmra.mrb[8].mxu0 %vm669_vm3, %v965_v23  ;;  %v1223_v23 = vsel %vm1164_vm5, %v3376_v25, 0  ;;  %vm1563_vm3 = vcmask 1044480  }
 0x17f   : > { %v1012_v27 = vpop.f32.mrb[0].mxu0 }
 0x180   : > { %vm1041_vm6 = vcmp.gt.f32.partialorder %v1012_v27, 0.0  ;;  %v1047_v28 = vmul.f32 0.2, %v1012_v27  ;;  %v2705_v29 = vpop.f32.mrb[1].mxu0 }
 0x181   : > { %v1015_v30 = vpop.f32.mrb[2].mxu0 }
 0x182   : > { %v1053_v31 = vsel %vm1041_vm6, %v1012_v27, %v1047_v28  ;;  %vm1042_vm7 = vcmp.gt.f32.partialorder %v1015_v30, 0.0  ;;  %v1048_v32 = vmul.f32 0.2, %v1015_v30  ;;  %v2706_v33 = vpop.f32.mrb[3].mxu0 }
 0x183   : > { %v1065_v34 = vrot.slane %v1053_v31, 7 }
 0x184   : > { %v1054_v35 = vsel %vm1042_vm7, %v1015_v30, %v1048_v32 }
 0x185   : > { %v1077_v36 = vsel %vm620_vm2, 0.0, %v1065_v34  ;;  %v1083_v37 = vsel %vm620_vm2, %v1065_v34, 0.0  ;;  %v1066_v38 = vrot.slane %v1054_v35, 7 }
 0x186   : > { %1090 = vst.msk [vmem:[#allocation3] sm:$0xff] %vm1089_vm8, %v1077_v36  ;;  %v1306_v36 = vsel %vm1164_vm5, %v1105_v26, 0 }
 0x187   : > { %1092 = vst.msk [vmem:[#allocation3 + $0x8] sm:$0x3] %vm1091_vm9, %v1083_v37  ;;  %v1078_v39 = vsel %vm620_vm2, 0.0, %v1066_v38  ;;  %v1084_v40 = vsel %vm620_vm2, %v1066_v38, 0.0  ;;  %v1020_v41 = vpop.f32.mrb[4].mxu0 }
 0x188   : > { %1093 = vst.msk [vmem:[#allocation3 + $0x10] sm:$0xff] %vm1089_vm8, %v1078_v39  ;;  %vm1043_vm10 = vcmp.gt.f32.partialorder %v1020_v41, 0.0  ;;  %v1049_v42 = vmul.f32 0.2, %v1020_v41  ;;  %v2709_v43 = vpop.f32.mrb[5].mxu0 }
 0x189   : > { %1094 = vst.msk [vmem:[#allocation3 + $0x18] sm:$0x3] %vm1091_vm9, %v1084_v40  ;;  %v1023_v44 = vpop.f32.mrb[6].mxu0  ;;  %v1106_v38 = vld [vmem:[%s3372_s17 + $0xc] sm:$0xf]  ;;  %s594_s17 = scalar_lea.vmem %s3573_s11, %s2603_s12 }
 0x18a   : > { %v1055_v45 = vsel %vm1043_vm10, %v1020_v41, %v1049_v42  ;;  %vm1044_vm11 = vcmp.gt.f32.partialorder %v1023_v44, 0.0  ;;  %v1050_v46 = vmul.f32 0.2, %v1023_v44  ;;  %v2710_v47 = vpop.f32.mrb[7].mxu0  ;;  %vm2132_vm10 = vcmask 1042434  }
 0x18b   : > { %v1067_v48 = vrot.slane %v1055_v45, 7 }
 0x18c   : > { %v1056_v49 = vsel %vm1044_vm11, %v1023_v44, %v1050_v46  ;;  %vm2135_vm11 = vcmask 1043459  }
 0x18d   : > { %v1079_v50 = vsel %vm620_vm2, 0.0, %v1067_v48  ;;  %v1085_v51 = vsel %vm620_vm2, %v1067_v48, 0.0  ;;  %v1068_v52 = vrot.slane %v1056_v49, 7  ;;  %v1133_v5 = vld [vmem:[#allocation3 + $0x1] ss:$2 sm:$0xf] }
 0x18e   : > { %1095 = vst.msk [vmem:[#allocation3 + $0x20] sm:$0xff] %vm1089_vm8, %v1079_v50  ;;  %v1107_v20 = vld [vmem:[#allocation3] ss:$2 sm:$0xf]  ;;  %v1392_v49 = vsel %vm1164_vm5, %v1106_v38, 0 }
 0x18f   : > { %1096 = vst.msk [vmem:[#allocation3 + $0x28] sm:$0x3] %vm1091_vm9, %v1085_v51  ;;  %v1080_v53 = vsel %vm620_vm2, 0.0, %v1068_v52  ;;  %v1086_v54 = vsel %vm620_vm2, %v1068_v52, 0.0  ;;  %v1028_v55 = vpop.f32.mrb[8].mxu0 }
 0x190   : > { %1097 = vst.msk [vmem:[#allocation3 + $0x30] sm:$0xff] %vm1089_vm8, %v1080_v53  ;;  %vm1045_vm12 = vcmp.gt.f32.partialorder %v1028_v55, 0.0  ;;  %v1051_v56 = vmul.f32 0.2, %v1028_v55  ;;  %v2713_v57 = vpop.f32.mrb[9].mxu0 }
 0x191   : > { %1098 = vst.msk [vmem:[#allocation3 + $0x38] sm:$0x3] %vm1091_vm9, %v1086_v54  ;;  %v1031_v58 = vpop.f32.mrb[10].mxu0  ;;  %v1135_v4 = vld [vmem:[#allocation3 + $0x11] ss:$2 sm:$0xf] }
 0x192   : > { %v1057_v59 = vsel %vm1045_vm12, %v1028_v55, %v1051_v56  ;;  %vm1046_vm13 = vcmp.gt.f32.partialorder %v1031_v58, 0.0  ;;  %v1052_v60 = vmul.f32 0.2, %v1031_v58  ;;  %v2714_v61 = vpop.f32.mrb[11].mxu0  ;;  %v1150_v10 = vcombine.low %v1133_v5, %v1135_v4  ;;  %v2928_v55 = vld [vmem:[%s3431_s27 + $0x8] sm:$0xff]  }
 0x193   : > { %v1069_v62 = vrot.slane %v1057_v59, 7  ;;  %v1109_v14 = vld [vmem:[#allocation3 + $0x10] ss:$2 sm:$0xf]  ;;  %vm2138_vm12 = vcmask 1044484  }
 0x194   : > { %v1058_v63 = vsel %vm1046_vm13, %v1031_v58, %v1052_v60  ;;  %v1124_v21 = vcombine.low %v1107_v20, %v1109_v14  ;;  %v1276_v31 = vld [vmem:[#allocation3 + $0x12] ss:$2 sm:$0xf]  ;;  %v1274_v34 = vld [vmem:[#allocation3 + $0x2] ss:$2 sm:$0xf] }
 0x195   : > { %v1081_v1 = vsel %vm620_vm2, 0.0, %v1069_v62  ;;  %v1087_v2 = vsel %vm620_vm2, %v1069_v62, 0.0  ;;  %v1070_v3 = vrot.slane %v1058_v63, 7  ;;  %v1137_v6 = vld [vmem:[#allocation3 + $0x21] ss:$2 sm:$0xf]  ;;  %v1291_v35 = vcombine.low %v1274_v34, %v1276_v31 }
 0x196   : > { %1099 = vst.msk [vmem:[#allocation3 + $0x40] sm:$0xff] %vm1089_vm8, %v1081_v1  ;;  %v1111_v15 = vld [vmem:[#allocation3 + $0x20] ss:$2 sm:$0xf]  ;;  %vm2141_vm13 = vcmask 1045509  }
 0x197   : > { %1100 = vst.msk [vmem:[#allocation3 + $0x48] sm:$0x3] %vm1091_vm9, %v1087_v2  ;;  %v1082_v7 = vsel %vm620_vm2, 0.0, %v1070_v3  ;;  %v1088_v8 = vsel %vm620_vm2, %v1070_v3, 0.0 }
 0x198   : > { %v1139_v9 = vld [vmem:[#allocation3 + $0x31] ss:$2 sm:$0xf]  ;;  %1101 = vst.msk [vmem:[#allocation3 + $0x50] sm:$0xff] %vm1089_vm8, %v1082_v7 }
 0x199   : > { %1102 = vst.msk [vmem:[#allocation3 + $0x58] sm:$0x3] %vm1091_vm9, %v1088_v8  ;;  %v1151_v11 = vcombine.low %v1137_v6, %v1139_v9  ;;  %v1113_v13 = vld [vmem:[#allocation3 + $0x30] ss:$2 sm:$0xf]  ;;  %vm2129_vm9 = vcmask 1041409  }
 0x19a   : > { %v1125_v18 = vcombine.low %v1111_v15, %v1113_v13  ;;  %v1280_v28 = vld [vmem:[#allocation3 + $0x32] ss:$2 sm:$0xf]  ;;  %v1278_v32 = vld [vmem:[#allocation3 + $0x22] ss:$2 sm:$0xf] }
 0x19b   : > { %v1156_v12 = vpack.c.bf16 %v1151_v11, %v1150_v10  ;;  %v1292_v33 = vcombine.low %v1278_v32, %v1280_v28  ;;  %v1366_v40 = vld [vmem:[#allocation3 + $0x33] ss:$2 sm:$0xf]  ;;  %v1364_v44 = vld [vmem:[#allocation3 + $0x23] ss:$2 sm:$0xf] }
 0x19c   : > { %v1130_v24 = vpack.c.bf16 %v1125_v18, %v1124_v21  ;;  %v1362_v43 = vld [vmem:[#allocation3 + $0x13] ss:$2 sm:$0xf]  ;;  %v1378_v45 = vcombine.low %v1364_v44, %v1366_v40  ;;  %v1360_v46 = vld [vmem:[#allocation3 + $0x3] ss:$2 sm:$0xf] }
 0x19d   : > { %2717 = vmatprep.mubr.msk.bf16.mxu1 %vm1089_vm8, %v1156_v12  ;;  %v1141_v16 = vld [vmem:[#allocation3 + $0x41] ss:$2 sm:$0xf]  ;;  %v1115_v29 = vld [vmem:[#allocation3 + $0x40] ss:$2 sm:$0xf]  ;;  %v1297_v37 = vpack.c.bf16 %v1292_v33, %v1291_v35  ;;  %v1377_v47 = vcombine.low %v1360_v46, %v1362_v43 }
 0x19e   : > { %v1282_v41 = vld [vmem:[#allocation3 + $0x42] ss:$2 sm:$0xf]  ;;  %v1368_v52 = vld [vmem:[#allocation3 + $0x43] ss:$2 sm:$0xf] }
 0x19f   : > { %v1143_v17 = vld [vmem:[#allocation3 + $0x51] ss:$2 sm:$0xf]  ;;  %v1117_v27 = vld [vmem:[#allocation3 + $0x50] ss:$2 sm:$0xf]  ;;  %v1383_v50 = vpack.c.bf16 %v1378_v45, %v1377_v47 }
 0x1a0   : > { %v1152_v19 = vcombine.low %v1141_v16, %v1143_v17  ;;  %v1126_v30 = vcombine.low %v1115_v29, %v1117_v27  ;;  %v1284_v39 = vld [vmem:[#allocation3 + $0x52] ss:$2 sm:$0xf]  ;;  %v1370_v51 = vld [vmem:[#allocation3 + $0x53] ss:$2 sm:$0xf] }
 0x1a1   : > { %v1293_v42 = vcombine.low %v1282_v41, %v1284_v39  ;;  %v1379_v53 = vcombine.low %v1368_v52, %v1370_v51 }
 0x1a2   : > { %v1157_v22 = vpack.c.bf16 %v1152_v19, %v1152_v19  ;;  %v1131_v25 = vpack.c.bf16 %v1126_v30, %v1126_v30 }
 0x1a3   : > { %v1298_v48 = vpack.c.bf16 %v1293_v42, %v1293_v42  ;;  %v1384_v54 = vpack.c.bf16 %v1379_v53, %v1379_v53 }
 0x1a4   : > { %2718 = vmatmul.mubr.msk.bf16.vlgmr.msra.gmra.mrb[0].mxu1 %vm1089_vm8, %v1157_v22 }
 0x1a5   : > { %2722 = vmatpush3.bf16.msra.mxu1 %v1223_v23  ;;  %2723 = vmatprep.mubr.msk.bf16.mxu1 %vm1089_vm8, %v1130_v24 }
 0x1a6   : > { %2876 = vmatprep.subr.msk.bf16.mxu1 %vm1164_vm5, %v1105_v26 }
 0x1b0   : > { %2724 = vmatmul.mubr.msk.bf16.vlgmr.msra.gmra.mrb[0].mxu1 %vm1089_vm8, %v1131_v25 }
 0x1b1   : > { %2728 = vmatpush3.bf16.msra.mxu1 %v1306_v36  ;;  %2729 = vmatprep.mubr.msk.bf16.mxu1 %vm1089_vm8, %v1297_v37 }
 0x1b2   : > { %2877 = vmatprep.subr.msk.bf16.mxu1 %vm1164_vm5, %v1106_v38  ;;  %vm1570_vm5 = vcmask 128000  }
 0x1bc   : > { %2730 = vmatmul.mubr.msk.bf16.vlgmr.msra.gmra.mrb[0].mxu1 %vm1089_vm8, %v1298_v48 }
 0x1bd   : > { %2734 = vmatpush3.bf16.msra.mxu1 %v1392_v49  ;;  %2735 = vmatprep.mubr.msk.bf16.mxu1 %vm1089_vm8, %v1383_v50 }
 0x1be   : > { %2739 = vmatprep.subr.bf16.mxu1 %v3050_v0 }
 0x1c8   : > { %2736 = vmatmul.mubr.msk.bf16.vlgmr.msra.gmra.mrb[0].mxu1 %vm1089_vm8, %v1384_v54 }
 0x1c9   : > { %2741 = vmatprep.mubr.msk.bf16.mxu1 %vm3051_vm0, %v3050_v0  ;;  %2740 = vmatpush3.bf16.msra.mxu1 %v2928_v55  ;;  %v2581_v55 = vld [vmem:[%s569_s16] ss:$0 sm:$0xff]  ;;  %s590_s16 = scalar_lea.vmem %s3572_s10, %s3589_s21 }
 0x1ca   : > { %2745 = vmatprep.subr.bf16.mxu1 %v3050_v0 }
 0x29b   : > { %v2737_v56 = vpop.f32.mrb[0].mxu1 }
 0x29c   : > { %v1462_v57 = vsel %vm1447_vm14, %v2737_v56, 0.0  ;;  %v1428_v58 = vpop.f32.mrb[1].mxu1 }
 0x29d   : > { %v1463_v59 = vrot.slane %v1462_v57, 4  ;;  %v1448_v60 = vsel %vm1447_vm14, %v1428_v58, 0.0  ;;  %v2738_v61 = vpop.f32.mrb[2].mxu1 }
 0x29e   : > { %v1449_v62 = vrot.slane %v1448_v60, 4  ;;  %v1431_v63 = vpop.f32.mrb[3].mxu1 }
 0x29f   : > { %v1464_v1 = vadd.f32 %v1463_v59, %v1462_v57  ;;  %v1455_v2 = vsel %vm1447_vm14, %v1431_v63, 0.0 }
 0x2a0   : > { %v1450_v3 = vadd.f32 %v1449_v62, %v1448_v60  ;;  %v1456_v4 = vrot.slane %v1455_v2, 4 }
 0x2a1   : > { %v1465_v5 = vrot.slane %v1464_v1, 2 }
 0x2a2   : > { %v1451_v6 = vrot.slane %v1450_v3, 2  ;;  %v1457_v7 = vadd.f32 %v1456_v4, %v1455_v2 }
 0x2a3   : > { %v1466_v8 = vadd.f32 %v1465_v5, %v1464_v1 }
 0x2a4   : > { %v1452_v9 = vadd.f32 %v1451_v6, %v1450_v3  ;;  %v1458_v10 = vrot.slane %v1457_v7, 2 }
 0x2a5   : > { %v1467_v11 = vrot.slane %v1466_v8, 1 }
 0x2a6   : > { %v1453_v12 = vrot.slane %v1452_v9, 1  ;;  %v1459_v13 = vadd.f32 %v1458_v10, %v1457_v7 }
 0x2a7   : > { %v1468_v14 = vadd.f32 %v1467_v11, %v1466_v8 }
 0x2a8   : > { %v1454_v15 = vadd.f32 %v1453_v12, %v1452_v9  ;;  %v1460_v16 = vrot.slane %v1459_v13, 1 }
 0x2a9   : > { %v1472_v17 = vmul.f32 0.125, %v1468_v14 }
 0x2aa   : > { %v1470_v18 = vmul.f32 0.125, %v1454_v15  ;;  %v1461_v19 = vadd.f32 %v1460_v16, %v1459_v13 }
 0x2ab   : > { %v1475_v20 = vsub.f32 %v2737_v56, %v1472_v17 }
 0x2ac   : > { %v1473_v21 = vsub.f32 %v1428_v58, %v1470_v18  ;;  %v1471_v22 = vmul.f32 0.125, %v1461_v19  ;;  %v2582_v58 = vld [vmem:[%s464_s28] ss:$0 sm:$0xff]  ;;  %s3054_s28 = smov 64  }
 0x2ad   : > { %v1478_v23 = vmul.f32 %v1475_v20, %v1475_v20 }
 0x2ae   : > { %v1476_v24 = vmul.f32 %v1473_v21, %v1473_v21  ;;  %v1474_v26 = vsub.f32 %v1431_v63, %v1471_v22 }
 0x2af   : > { %v1493_v27 = vsel %vm1447_vm14, %v1478_v23, 0.0 }
 0x2b0   : > { %v1494_v28 = vrot.slane %v1493_v27, 4  ;;  %v1479_v29 = vsel %vm1447_vm14, %v1476_v24, 0.0  ;;  %v1477_v30 = vmul.f32 %v1474_v26, %v1474_v26 }
 0x2b1   : > { %v1480_v31 = vrot.slane %v1479_v29, 4 }
 0x2b2   : > { %v1495_v32 = vadd.f32 %v1494_v28, %v1493_v27  ;;  %v1486_v33 = vsel %vm1447_vm14, %v1477_v30, 0.0 }
 0x2b3   : > { %v1481_v34 = vadd.f32 %v1480_v31, %v1479_v29  ;;  %v1487_v35 = vrot.slane %v1486_v33, 4 }
 0x2b4   : > { %v1496_v25 = vrot.slane %v1495_v32, 2 }
 0x2b5   : > { %v1482_v36 = vrot.slane %v1481_v34, 2  ;;  %v1488_v37 = vadd.f32 %v1487_v35, %v1486_v33 }
 0x2b6   : > { %v1497_v38 = vadd.f32 %v1496_v25, %v1495_v32  ;;  %v3052_v32 = vmov 1983009808  }
 0x2b7   : > { %v1483_v39 = vadd.f32 %v1482_v36, %v1481_v34  ;;  %v1489_v40 = vrot.slane %v1488_v37, 2  ;;  %v1605_v33 = vunpack.c.l.s4 %v3052_v32  ;;  %v1607_v34 = vlaneseq }
 0x2b8   : > { %v1498_v41 = vrot.slane %v1497_v38, 1 }
 0x2b9   : > { %v1484_v42 = vrot.slane %v1483_v39, 1  ;;  %v1490_v43 = vadd.f32 %v1489_v40, %v1488_v37  ;;  %v1606_v25 = vunpack.c.0.s8 %v1605_v33  ;;  %v1608_v36 = vshrl.u32 %v1607_v34, 7 }
 0x2ba   : > { %v1499_v44 = vadd.f32 %v1498_v41, %v1497_v38 }
 0x2bb   : > { %v1485_v45 = vadd.f32 %v1484_v42, %v1483_v39  ;;  %v1491_v46 = vrot.slane %v1490_v43, 1  ;;  %v3465_v40 = vsub.s32 %v1606_v25, %v1608_v36  ;;  %v2933_v25 = vld [vmem:[%s3502_s15 + $0x18] sm:$0xff]  }
 0x2bc   : > { %v1502_v47 = vmul.f32 0.125, %v1499_v44 }
 0x2bd   : > { %v1500_v48 = vmul.f32 0.125, %v1485_v45  ;;  %v1492_v49 = vadd.f32 %v1491_v46, %v1490_v43 }
 0x2be   : > { %v1505_v50 = vadd.f32 1e-05, %v1502_v47 }
 0x2bf   : > { %v1503_v51 = vadd.f32 1e-05, %v1500_v48  ;;  %v1501_v52 = vmul.f32 0.125, %v1492_v49 }
 0x2c0   : > { %2936 = vrsqrt.f32 %v1505_v50 }
 0x2c1   : > { %2938 = vrsqrt.f32 %v1503_v51  ;;  %v1504_v53 = vadd.f32 1e-05, %v1501_v52  ;;  %v2929_v52 = vld [vmem:[%s3431_s27] sm:$0xff]  }
 0x2c3   : > { %2940 = vrsqrt.f32 %v1504_v53 }
 0x2ca   : > { %v2937_v54 = vpop.eup %2936 }
 0x2cb   : > { %v2939_v56 = vpop.eup %2938  ;;  %v1511_v57 = vmul.f32 %v2937_v54, %v1475_v20 }
 0x2cc   : > { %v1509_v59 = vmul.f32 %v2939_v56, %v1473_v21 }
 0x2cd   : > { %v2941_v60 = vpop.eup %2940  ;;  %v1520_v61 = vmul.f32 %v2581_v55, %v1511_v57 }
 0x2ce   : > { %v1518_v62 = vmul.f32 %v2581_v55, %v1509_v59  ;;  %v1510_v63 = vmul.f32 %v2941_v60, %v1474_v26 }
 0x2cf   : > { %v1529_v1 = vadd.f32 %v2582_v58, %v1520_v61 }
 0x2d0   : > { %v1527_v2 = vadd.f32 %v2582_v58, %v1518_v62  ;;  %v1519_v3 = vmul.f32 %v2581_v55, %v1510_v63 }
 0x2d1   : > { %vm1532_vm15 = vcmp.gt.f32.partialorder %v1529_v1, 0.0  ;;  %v1535_v4 = vmul.f32 0.2, %v1529_v1 }
 0x2d2   : > { %vm1530_vm1 = vcmp.gt.f32.partialorder %v1527_v2, 0.0  ;;  %v1533_v5 = vmul.f32 0.2, %v1527_v2  ;;  %v1528_v6 = vadd.f32 %v2582_v58, %v1519_v3 }
 0x2d3   : > { %v1538_v7 = vsel %vm1532_vm15, %v1529_v1, %v1535_v4  ;;  %v2930_v4 = vld [vmem:[%s3431_s27 + $0x10] sm:$0xff]   ;;  %vm2282_vm15 = vcmask 523264  }
 0x2d4   : > { %v1544_v8 = vcombine.high %v1538_v7, %v1538_v7  ;;  %v1549_v9 = vrot.slane %v1538_v7, 7  ;;  %v1536_v10 = vsel %vm1530_vm1, %v1527_v2, %v1533_v5  ;;  %vm1531_vm4 = vcmp.gt.f32.partialorder %v1528_v6, 0.0 }
 0x2d5   : > { %v1542_v11 = vcombine.high %v1536_v10, %v1536_v10  ;;  %v1545_v12 = vrot.slane %v1536_v10, 7  ;;  %v1534_v13 = vmul.f32 0.2, %v1528_v6 }
 0x2d6   : > { %v1550_v14 = vrot.slane %v1544_v8, 7  ;;  %v1561_v15 = vsel %vm620_vm2, 0.0, %v1549_v9 }
 0x2d7   : > { %v1568_v16 = vsel %vm1563_vm3, %v1561_v15, 0.0  ;;  %v1546_v17 = vrot.slane %v1542_v11, 7  ;;  %v1557_v18 = vsel %vm620_vm2, 0.0, %v1545_v12  ;;  %v1537_v19 = vsel %vm1531_vm4, %v1528_v6, %v1534_v13 }
 0x2d8   : > { %v1562_v20 = vsel %vm620_vm2, 0.0, %v1550_v14  ;;  %1575 = vst.msk [vmem:[#allocation4 + $0x20] sm:$0x3f] %vm1570_vm5, %v1568_v16  ;;  %v1564_v21 = vsel %vm1563_vm3, %v1557_v18, 0.0  ;;  %v1543_v22 = vcombine.high %v1537_v19, %v1537_v19  ;;  %v1547_v23 = vrot.slane %v1537_v19, 7  ;;  %v2931_v19 = vld [vmem:[%s3431_s27 + $0x18] sm:$0xff]   ;;  %s587_s27 = scalar_lea.vmem %s3571_s9, %s2607_s14 }
 0x2d9   : > { %v1569_v24 = vsel %vm1563_vm3, %v1562_v20, 0.0  ;;  %v1558_v26 = vsel %vm620_vm2, 0.0, %v1546_v17  ;;  %1571 = vst.msk [vmem:[#allocation4] sm:$0x3f] %vm1570_vm5, %v1564_v21 }
 0x2da   : > { %1576 = vst.msk [vmem:[#allocation4 + $0x28] sm:$0x3f] %vm1570_vm5, %v1569_v24  ;;  %v1565_v27 = vsel %vm1563_vm3, %v1558_v26, 0.0  ;;  %v1548_v28 = vrot.slane %v1543_v22, 7  ;;  %v1559_v29 = vsel %vm620_vm2, 0.0, %v1547_v23 }
 0x2db   : > { %1572 = vst.msk [vmem:[#allocation4 + $0x8] sm:$0x3f] %vm1570_vm5, %v1565_v27  ;;  %v1566_v30 = vsel %vm1563_vm3, %v1559_v29, 0.0 }
 0x2dc   : > { %v1560_v31 = vsel %vm620_vm2, 0.0, %v1548_v28  ;;  %1573 = vst.msk [vmem:[#allocation4 + $0x10] sm:$0x3f] %vm1570_vm5, %v1566_v30  ;;  %vm1977_vm2 = vcmask 257024  }
 0x2dd   : > { %v1567_v35 = vsel %vm1563_vm3, %v1560_v31, 0.0 }
 0x2de   : > { %1574 = vst.msk [vmem:[#allocation4 + $0x18] sm:$0x3f] %vm1570_vm5, %v1567_v35  ;;  %v2932_v35 = vld [vmem:[%s3502_s15 + $0x10] sm:$0xff]  }
 0x2df   : > { %v1639_v41 = vld [vmem:[#allocation4 + $0x21] ss:$2 sm:$0x3]  ;;  %v1593_v61 = vld [vmem:[#allocation4 + $0x20] ss:$2 sm:$0x3] }
 0x2e0   : > { %v1631_v38 = vld [vmem:[#allocation4 + $0x1] ss:$2 sm:$0x3]  ;;  %v1585_v57 = vld [vmem:[#allocation4] ss:$2 sm:$0x3] }
 0x2e1   : > { %v1641_v39 = vld [vmem:[#allocation4 + $0x29] ss:$2 sm:$0x3]  ;;  %v1595_v59 = vld [vmem:[#allocation4 + $0x28] ss:$2 sm:$0x3] }
 0x2e2   : > { %v1633_v37 = vld [vmem:[#allocation4 + $0x9] ss:$2 sm:$0x3]  ;;  %v1665_v46 = vcombine.low %v1639_v41, %v1641_v39  ;;  %v1587_v53 = vld [vmem:[#allocation4 + $0x8] ss:$2 sm:$0x3]  ;;  %v1619_v63 = vcombine.low %v1593_v61, %v1595_v59 }
 0x2e3   : > { %v1648_v42 = vcombine.low %v1631_v38, %v1633_v37  ;;  %v1635_v43 = vld [vmem:[#allocation4 + $0x11] ss:$2 sm:$0x3]  ;;  %v1589_v54 = vld [vmem:[#allocation4 + $0x10] ss:$2 sm:$0x3]  ;;  %v1602_v58 = vcombine.low %v1585_v57, %v1587_v53 }
 0x2e4   : > { %v1672_v51 = vrot.slane %v1665_v46, %v3465_v40  ;;  %v1626_v3 = vrot.slane %v1619_v63, %v3465_v40  ;;  %v1779_v5 = vld [vmem:[#allocation4 + $0xa] ss:$2 sm:$0x3]  ;;  %v1781_v6 = vld [vmem:[#allocation4 + $0x12] ss:$2 sm:$0x3] }
 0x2e5   : > { %v1637_v44 = vld [vmem:[#allocation4 + $0x19] ss:$2 sm:$0x3]  ;;  %v1656_v47 = vrot.slane %v1648_v42, %v3465_v40  ;;  %v1591_v49 = vld [vmem:[#allocation4 + $0x18] ss:$2 sm:$0x3]  ;;  %v1610_v62 = vrot.slane %v1602_v58, %v3465_v40 }
 0x2e6   : > { %v1649_v45 = vcombine.low %v1635_v43, %v1637_v44  ;;  %v1603_v56 = vcombine.low %v1589_v54, %v1591_v49  ;;  %v1783_v2 = vld [vmem:[#allocation4 + $0x1a] ss:$2 sm:$0x3]  ;;  %v1777_v9 = vld [vmem:[#allocation4 + $0x2] ss:$2 sm:$0x3] }
 0x2e7   : > { %v1795_v8 = vcombine.low %v1781_v6, %v1783_v2  ;;  %v1794_v10 = vcombine.low %v1777_v9, %v1779_v5  ;;  %v1787_v11 = vld [vmem:[#allocation4 + $0x2a] ss:$2 sm:$0x3]  ;;  %v1785_v13 = vld [vmem:[#allocation4 + $0x22] ss:$2 sm:$0x3] }
 0x2e8   : > { %v1663_v48 = vrot.slane %v1649_v45, %v3465_v40  ;;  %v1617_v60 = vrot.slane %v1603_v56, %v3465_v40  ;;  %v1811_v15 = vcombine.low %v1785_v13, %v1787_v11  ;;  %v1881_v17 = vld [vmem:[#allocation4 + $0x1b] ss:$2 sm:$0x3]  ;;  %v1877_v20 = vld [vmem:[#allocation4 + $0xb] ss:$2 sm:$0x3] }
 0x2e9   : > { %v1809_v12 = vrot.slane %v1795_v8, %v3465_v40  ;;  %v1802_v14 = vrot.slane %v1794_v10, %v3465_v40  ;;  %v1879_v21 = vld [vmem:[#allocation4 + $0x13] ss:$2 sm:$0x3]  ;;  %v1875_v24 = vld [vmem:[#allocation4 + $0x3] ss:$2 sm:$0x3] }
 0x2ea   : > { %v1664_v50 = vcombine.low %v1656_v47, %v1663_v48  ;;  %v1618_v1 = vcombine.low %v1610_v62, %v1617_v60  ;;  %v1818_v18 = vrot.slane %v1811_v15, %v3465_v40  ;;  %v1893_v23 = vcombine.low %v1879_v21, %v1881_v17  ;;  %v1885_v27 = vld [vmem:[#allocation4 + $0x2b] ss:$2 sm:$0x3]  ;;  %v1883_v29 = vld [vmem:[#allocation4 + $0x23] ss:$2 sm:$0x3] }
 0x2eb   : > { %v1810_v16 = vcombine.low %v1802_v14, %v1809_v12  ;;  %v1892_v26 = vcombine.low %v1875_v24, %v1877_v20  ;;  %v1909_v31 = vcombine.low %v1883_v29, %v1885_v27 }
 0x2ec   : > { %v1675_v55 = vpack.c.bf16 %v1672_v51, %v1664_v50  ;;  %v1629_v7 = vpack.c.bf16 %v1626_v3, %v1618_v1  ;;  %v1907_v28 = vrot.slane %v1893_v23, %v3465_v40 }
 0x2ed   : > { %v1821_v22 = vpack.c.bf16 %v1818_v18, %v1810_v16  ;;  %v1900_v30 = vrot.slane %v1892_v26, %v3465_v40  ;;  %v1916_v33 = vrot.slane %v1909_v31, %v3465_v40 }
 0x2ee   : > { %2742 = vmatmul.mubr.msk.bf16.vlgmr.msra.gmra.mrb[4].mxu1 %vm1447_vm14, %v1675_v55 }
 0x2ef   : > { %2746 = vmatpush3.bf16.msra.mxu1 %v2929_v52  ;;  %2747 = vmatprep.mubr.msk.bf16.mxu1 %vm3051_vm0, %v3050_v0  ;;  %v1908_v32 = vcombine.low %v1900_v30, %v1907_v28 }
 0x2f0   : > { %2751 = vmatprep.subr.bf16.mxu1 %v3050_v0 }
 0x2f1   : > { %v1919_v34 = vpack.c.bf16 %v1916_v33, %v1908_v32 }
 0x2fa   : > { %2748 = vmatmul.mubr.msk.bf16.vlgmr.msra.gmra.mrb[4].mxu1 %vm1447_vm14, %v1629_v7 }
 0x2fb   : > { %2752 = vmatpush3.bf16.msra.mxu1 %v2930_v4  ;;  %2753 = vmatprep.mubr.msk.bf16.mxu1 %vm3051_vm0, %v3050_v0 }
 0x2fc   : > { %2757 = vmatprep.subr.bf16.mxu1 %v3050_v0 }
 0x306   : > { %2754 = vmatmul.mubr.msk.bf16.vlgmr.msra.gmra.mrb[4].mxu1 %vm1447_vm14, %v1821_v22 }
 0x307   : > { %2758 = vmatpush3.bf16.msra.mxu1 %v2931_v19  ;;  %2759 = vmatprep.mubr.msk.bf16.mxu1 %vm3051_vm0, %v3050_v0 }
 0x308   : > { %2763 = vmatprep.subr.bf16.mxu1 %v3050_v0 }
 0x312   : > { %2760 = vmatmul.mubr.msk.bf16.vlgmr.msra.gmra.mrb[4].mxu1 %vm1447_vm14, %v1919_v34  ;;  %vm2156_vm14 = vcmask 261120  }
 0x313   : > { %2767 = vmatprep.mubr.msk.bf16.mxu1 %vm3051_vm0, %v3050_v0  ;;  %2764 = vmatpush3.bf16.msra.mxu1 %v2932_v35 }
 0x314   : > { %2765 = vmatprep.subr.bf16.mxu1 %v3050_v0 }
 0x317   : > { %2766 = vmatpush3.bf16.msra.mxu1 %v2933_v25 }
 0x318   : > { %2771 = vmatprep.subr.bf16.mxu1 %v3050_v0 }
 0x3e5   : > { %v1963_v36 = vpop.f32.mrb[4].mxu1 }
 0x3e6   : > { %v1975_v37 = vcombine.high %v1963_v36, %v1963_v36  ;;  %v1978_v38 = vsel %vm1977_vm2, %v1963_v36, 0.0  ;;  %v2761_v39 = vpop.f32.mrb[5].mxu1 }
 0x3e7   : > { %v1979_v41 = vrot.slane %v1978_v38, 4  ;;  %v1966_v42 = vpop.f32.mrb[6].mxu1 }
 0x3e8   : > { %v1985_v43 = vsel %vm1977_vm2, %v1975_v37, 0.0  ;;  %v1992_v44 = vsel %vm1977_vm2, %v1966_v42, 0.0  ;;  %v2762_v45 = vpop.f32.mrb[7].mxu1 }
 0x3e9   : > { %v1980_v46 = vadd.f32 %v1979_v41, %v1978_v38  ;;  %v1986_v47 = vrot.slane %v1985_v43, 4  ;;  %v1993_v48 = vrot.slane %v1992_v44, 4  ;;  %v2592_v41 = vld [vmem:[%s472_s23] ss:$0 sm:$0xff] }
 0x3eb   : > { %v1981_v49 = vrot.slane %v1980_v46, 2  ;;  %v1987_v50 = vadd.f32 %v1986_v47, %v1985_v43  ;;  %v1994_v51 = vadd.f32 %v1993_v48, %v1992_v44 }
 0x3ed   : > { %v1982_v52 = vadd.f32 %v1981_v49, %v1980_v46  ;;  %v1988_v53 = vrot.slane %v1987_v50, 2  ;;  %v1995_v54 = vrot.slane %v1994_v51, 2 }
 0x3ef   : > { %v1983_v55 = vrot.slane %v1982_v52, 1  ;;  %v1989_v56 = vadd.f32 %v1988_v53, %v1987_v50  ;;  %v1996_v57 = vadd.f32 %v1995_v54, %v1994_v51 }
 0x3f1   : > { %v1984_v58 = vadd.f32 %v1983_v55, %v1982_v52  ;;  %v1990_v59 = vrot.slane %v1989_v56, 1  ;;  %v1997_v60 = vrot.slane %v1996_v57, 1 }
 0x3f3   : > { %v1991_v61 = vadd.f32 %v1990_v59, %v1989_v56  ;;  %v2000_v62 = vmul.f32 0.25, %v1984_v58  ;;  %v1998_v63 = vadd.f32 %v1997_v60, %v1996_v57 }
 0x3f5   : > { %v2001_v1 = vmul.f32 0.25, %v1991_v61  ;;  %v2003_v2 = vsub.f32 %v1963_v36, %v2000_v62  ;;  %v2002_v3 = vmul.f32 0.25, %v1998_v63 }
 0x3f7   : > { %v2004_v4 = vsub.f32 %v1975_v37, %v2001_v1  ;;  %v2006_v5 = vmul.f32 %v2003_v2, %v2003_v2  ;;  %v2005_v6 = vsub.f32 %v1966_v42, %v2002_v3  ;;  %v2591_v37 = vld [vmem:[%s577_s30] ss:$0 sm:$0xff] }
 0x3f9   : > { %v2007_v7 = vmul.f32 %v2004_v4, %v2004_v4  ;;  %v2009_v8 = vsel %vm1977_vm2, %v2006_v5, 0.0  ;;  %v2008_v9 = vmul.f32 %v2005_v6, %v2005_v6 }
 0x3fa   : > { %v2010_v10 = vrot.slane %v2009_v8, 4 }
 0x3fb   : > { %v2016_v11 = vsel %vm1977_vm2, %v2007_v7, 0.0  ;;  %v2023_v12 = vsel %vm1977_vm2, %v2008_v9, 0.0 }
 0x3fc   : > { %v2011_v13 = vadd.f32 %v2010_v10, %v2009_v8  ;;  %v2017_v14 = vrot.slane %v2016_v11, 4  ;;  %v2024_v15 = vrot.slane %v2023_v12, 4 }
 0x3fe   : > { %v2012_v16 = vrot.slane %v2011_v13, 2  ;;  %v2018_v17 = vadd.f32 %v2017_v14, %v2016_v11  ;;  %v2025_v18 = vadd.f32 %v2024_v15, %v2023_v12 }
 0x400   : > { %v2013_v19 = vadd.f32 %v2012_v16, %v2011_v13  ;;  %v2019_v20 = vrot.slane %v2018_v17, 2  ;;  %v2026_v21 = vrot.slane %v2025_v18, 2 }
 0x402   : > { %v2014_v22 = vrot.slane %v2013_v19, 1  ;;  %v2020_v23 = vadd.f32 %v2019_v20, %v2018_v17  ;;  %v2027_v24 = vadd.f32 %v2026_v21, %v2025_v18 }
 0x404   : > { %v2015_v26 = vadd.f32 %v2014_v22, %v2013_v19  ;;  %v2021_v27 = vrot.slane %v2020_v23, 1  ;;  %v2028_v28 = vrot.slane %v2027_v24, 1 }
 0x406   : > { %v2022_v29 = vadd.f32 %v2021_v27, %v2020_v23  ;;  %v2030_v30 = vmul.f32 0.25, %v2015_v26  ;;  %v2029_v31 = vadd.f32 %v2028_v28, %v2027_v24 }
 0x408   : > { %v2031_v32 = vmul.f32 0.25, %v2022_v29  ;;  %v2033_v33 = vadd.f32 1e-05, %v2030_v30  ;;  %v2032_v34 = vmul.f32 0.25, %v2029_v31  ;;  %v2934_v31 = vld [vmem:[%s3502_s15] sm:$0xff]  }
 0x40a   : > { %v2034_v35 = vadd.f32 1e-05, %v2031_v32  ;;  %2942 = vrsqrt.f32 %v2033_v33  ;;  %v2035_v25 = vadd.f32 1e-05, %v2032_v34  ;;  %v2935_v34 = vld [vmem:[%s3502_s15 + $0x8] sm:$0xff]  }
 0x40c   : > { %2944 = vrsqrt.f32 %v2034_v35  ;;  %v3053_v35 = vmov 0.0|0.0  }
 0x40d   : > { %2946 = vrsqrt.f32 %v2035_v25  ;;  %v2267_v25 = vld [vmem:[%s587_s27] sm:$0xff] }
 0x414   : > { %v2943_v36 = vpop.eup %2942 }
 0x415   : > { %v2039_v38 = vmul.f32 %v2943_v36, %v2003_v2  ;;  %v2268_v36 = vld [vmem:[%s587_s27 + $0x8] sm:$0xff] }
 0x416   : > { %v2945_v39 = vpop.eup %2944 }
 0x417   : > { %v2947_v42 = vpop.eup %2946  ;;  %v2040_v43 = vmul.f32 %v2945_v39, %v2004_v4  ;;  %v2048_v44 = vmul.f32 %v2591_v37, %v2039_v38  ;;  %v2269_v39 = vld [vmem:[%s587_s27 + $0x10] sm:$0xff] }
 0x418   : > { %v2041_v45 = vmul.f32 %v2947_v42, %v2005_v6 }
 0x419   : > { %v2049_v46 = vmul.f32 %v2591_v37, %v2040_v43  ;;  %v2057_v47 = vadd.f32 %v2592_v41, %v2048_v44  ;;  %v2271_v43 = vld [vmem:[%s587_s27 + $0x20] sm:$0xff]  ;;  %v2272_v44 = vld [vmem:[%s587_s27 + $0x28] sm:$0xff] }
 0x41a   : > { %v2050_v48 = vmul.f32 %v2591_v37, %v2041_v45  ;;  %v2799_v37 = vpack.c.bf16 %v2268_v36, %v2267_v25  ;;  %v2805_v45 = vpack.c.bf16 %v2272_v44, %v2271_v43 }
 0x41b   : > { %v2058_v49 = vadd.f32 %v2592_v41, %v2049_v46  ;;  %vm2060_vm6 = vcmp.gt.f32.partialorder %v2057_v47, 0.0  ;;  %v2063_v50 = vmul.f32 0.2, %v2057_v47  ;;  %v2273_v46 = vld [vmem:[%s587_s27 + $0x30] sm:$0xff] }
 0x41c   : > { %v2059_v51 = vadd.f32 %v2592_v41, %v2050_v48  ;;  %v2270_v41 = vld [vmem:[%s587_s27 + $0x18] sm:$0xff] }
 0x41d   : > { %vm2061_vm7 = vcmp.gt.f32.partialorder %v2058_v49, 0.0  ;;  %v2064_v52 = vmul.f32 0.2, %v2058_v49  ;;  %v2066_v53 = vsel %vm2060_vm6, %v2057_v47, %v2063_v50  ;;  %v2802_v42 = vpack.c.bf16 %v2270_v41, %v2269_v39  ;;  %v2274_v47 = vld [vmem:[%s587_s27 + $0x38] sm:$0xff] }
 0x41e   : > { %v2078_v54 = vrot.slane %v2066_v53, %v3465_v40  ;;  %vm2062_vm8 = vcmp.gt.f32.partialorder %v2059_v51, 0.0  ;;  %v2065_v55 = vmul.f32 0.2, %v2059_v51  ;;  %v2808_v48 = vpack.c.bf16 %v2274_v47, %v2273_v46 }
 0x41f   : > { %v2067_v56 = vsel %vm2061_vm7, %v2058_v49, %v2064_v52  ;;  %v2599_v52 = vld [vmem:[%s590_s16] ss:$0 sm:$0xff] }
 0x420   : > { %v2079_v57 = vcombine.high %v2078_v54, %v2078_v54  ;;  %v2086_v58 = vrot.slane %v2067_v56, %v3465_v40  ;;  %v2110_v59 = vpack.c.bf16 %v2078_v54, %v2078_v54  ;;  %v2068_v60 = vsel %vm2062_vm8, %v2059_v51, %v2065_v55 }
 0x421   : > { %v2094_v61 = vrot.slane %v2068_v60, %v3465_v40 }
 0x422   : > { %v2087_v62 = vcombine.high %v2086_v58, %v2086_v58  ;;  %v2111_v63 = vpack.c.bf16 %v2079_v57, %v2079_v57  ;;  %v2112_v1 = vpack.c.bf16 %v2086_v58, %v2086_v58  ;;  %v2122_v2 = vunpack.c.l.b16 %v2110_v59 }
 0x423   : > { %v2095_v3 = vcombine.high %v2094_v61, %v2094_v61  ;;  %v2114_v4 = vpack.c.bf16 %v2094_v61, %v2094_v61 }
 0x424   : > { %v2113_v5 = vpack.c.bf16 %v2087_v62, %v2087_v62  ;;  %v2123_v6 = vunpack.c.l.b16 %v2111_v63  ;;  %v2124_v7 = vunpack.c.l.b16 %v2112_v1  ;;  %v2128_v8 = vrot.slane %v2122_v2, 1 }
 0x425   : > { %v2115_v9 = vpack.c.bf16 %v2095_v3, %v2095_v3  ;;  %v2126_v10 = vunpack.c.l.b16 %v2114_v4 }
 0x426   : > { %v2125_v11 = vunpack.c.l.b16 %v2113_v5  ;;  %v2131_v12 = vrot.slane %v2124_v7, 7  ;;  %v2200_v13 = vrot.slane %v2123_v6, 7  ;;  %v2202_v14 = vrot.slane %v2124_v7, 6 }
 0x427   : > { %v2127_v15 = vunpack.c.l.b16 %v2115_v9  ;;  %v2130_v40 = vsel %vm2129_vm9, %v2123_v6, %v2128_v8  ;;  %v2137_v20 = vrot.slane %v2126_v10, 5  ;;  %v2206_v21 = vrot.slane %v2126_v10, 4 }
 0x428   : > { %v2133_v16 = vsel %vm2132_vm10, %v2131_v12, %v2130_v40  ;;  %v2134_v17 = vrot.slane %v2125_v11, 6  ;;  %v2201_v18 = vsel %vm2129_vm9, %v2200_v13, %v2122_v2  ;;  %v2204_v19 = vrot.slane %v2125_v11, 5 }
 0x429   : > { %v2203_v22 = vsel %vm2132_vm10, %v2202_v14, %v2201_v18  ;;  %v2140_v24 = vrot.slane %v2127_v15, 4  ;;  %v2208_v27 = vrot.slane %v2127_v15, 3 }
 0x42a   : > { %v2136_v23 = vsel %vm2135_vm11, %v2134_v17, %v2133_v16  ;;  %v2205_v26 = vsel %vm2135_vm11, %v2204_v19, %v2203_v22 }
 0x42b   : > { %v2139_v28 = vsel %vm2138_vm12, %v2137_v20, %v2136_v23  ;;  %v2207_v29 = vsel %vm2138_vm12, %v2206_v21, %v2205_v26 }
 0x42c   : > { %v2142_v30 = vsel %vm2141_vm13, %v2140_v24, %v2139_v28  ;;  %v2209_v32 = vsel %vm2141_vm13, %v2208_v27, %v2207_v29 }
 0x42d   : > { %v2143_v33 = vpack.c.b16 %v2142_v30, %v2142_v30  ;;  %v2210_v38 = vpack.c.b16 %v2209_v32, %v2209_v32 }
 0x42f   : > { %2768 = vmatmul.mubr.msk.bf16.vlgmr.msra.gmra.mrb[8].mxu1 %vm2156_vm14, %v2143_v33 }
 0x430   : > { %2772 = vmatpush3.bf16.msra.mxu1 %v2934_v31  ;;  %2775 = vmatprep.mubr.msk.bf16.mxu1 %vm3051_vm0, %v3050_v0 }
 0x431   : > { %2773 = vmatprep.subr.bf16.mxu1 %v3050_v0 }
 0x434   : > { %2774 = vmatpush3.bf16.msra.mxu1 %v2935_v34 }
 0x435   : > { %2798 = vmatprep.subr.bf16.mxu1 %v3053_v35 }
 0x43b   : > { %2776 = vmatmul.mubr.msk.bf16.vlgmr.msra.gmra.mrb[8].mxu1 %vm2156_vm14, %v2210_v38 }
 0x43c   : > { %2800 = vmatpush3.bf16.msra.mxu1 %v2799_v37  ;;  %2795 = vmatprep.mubr.msk.f32.mxu1 %vm3051_vm0, %v3050_v0 }
 0x43d   : > { %2801 = vmatprep.subr.bf16.mxu1 %v3053_v35 }
 0x440   : > { %2803 = vmatpush3.bf16.msra.mxu1 %v2802_v42 }
 0x441   : > { %2804 = vmatprep.subr.bf16.mxu1 %v3053_v35 }
 0x444   : > { %2806 = vmatpush3.bf16.msra.mxu1 %v2805_v45 }
 0x445   : > { %2807 = vmatprep.subr.bf16.mxu1 %v3053_v35 }
 0x448   : > { %2809 = vmatpush3.bf16.msra.mxu1 %v2808_v48 }
 0x50e   : > { %v2260_v49 = vpop.f32.mrb[8].mxu1 }
 0x50f   : > { %v2777_v50 = vpop.f32.mrb[9].mxu1  ;;  %2796 = vmatmul.mubr.msk.f32.vlgmr.msra.gmra.mrb[12].mxu1 %vm2282_vm15, %v2260_v49 }
 0x510   : > { %v2263_v51 = vpop.f32.mrb[10].mxu1 }
 0x511   : > { %v2778_v0 = vpop.f32.mrb[11].mxu1 }
 0x5e2   : > { %v2352_v53 = vpop.f32.mrb[12].mxu1 }
 0x5e3   : > { %v2353_v54 = vadd.f32 %v2599_v52, %v2352_v53  ;;  %v2797_v55 = vpop.f32.mrb[13].mxu1 }
 0x5e5   : > { %2357 = vrot.lane.b32.xlu0 %v2353_v54, %s3054_s28 }
 0x657   : > { %v2358_v56 = vpop.permute.xlu0 %2357 }
 0x658   : > { %v2360_v57 = vsel %vm2282_vm15, %v2260_v49, %v2358_v56 }
 0x659   : > { %2361 = vst [vmem:[%s594_s17] sm:$0x3f] %v2360_v57 }
 0x65a PF: > { %p24_p8 = scmp.ge.s32.totalorder %s3137_s22, 4   ;;  %s3584_s17 = smov %s3038_s18 }
 0x65b   : > { %s3585_s18 = smov %s3042_s19  ;;  %s3586_s19 = smov %s3147_s25 }
 0x65c   : > { %s3587_s20 = smov %s3137_s22  ;;  %26 = sbr.rel (!%p24_p8) target bundleno = 5 (0x5), region = 213 }
 0x663   :  { %2381 = vsyncpa [#allocation6], 1 }
 0x664   :  { %2383 = vsyncpa [#allocation6 + $0x1], 1 }
 0x665   :  { %2384 = vsyncpa [#allocation8], 1 }
 0x666   :  { %2386 = vsyncpa [#allocation8 + $0x1], 1 }

</bundles_post_ra>
